<compile_context>
chip_gen: v5e
topology: v5e:2x2
jax: 0.10.0
libtpu: 0.0.40
codegen_flags: <defaults>
</compile_context>

<pallas_src>
import jax
import jax.numpy as jnp
from jax import lax
from jax.experimental import pallas as pl
from jax.experimental.pallas import tpu as pltpu


# ---------------------------------------------------------------------------
# Kernels
# ---------------------------------------------------------------------------
def _input_proj_kernel(x_ref, wih_ref, b_ref, gx_ref):
    """gates_x = x @ W_ih + (b_ih + b_hh) over a (RB, E) row block."""
    gx_ref[...] = (
        jnp.dot(x_ref[...], wih_ref[...], preferred_element_type=jnp.float32)
        + b_ref[...]
    )


def _lstm_recurrence_kernel(gx_ref,      # VMEM (Tc*B, 4H) f32  pipelined chunk
                            whh_ref,     # VMEM (H, 4H)   bf16  resident
                            h0_ref,      # VMEM (B, H)    f32   constant
                            c0_ref,      # VMEM (B, H)    f32   constant
                            hall_ref,    # out  (Tc*B, H) f32   pipelined chunk
                            hout_ref,    # out  (B, H)    f32   final hidden
                            cout_ref,    # out  (B, H)    f32   final cell
                            h_sc,        # scratch (B, H) f32   recurrent carry
                            c_sc):       # scratch (B, H) f32
    chunk = pl.program_id(0)
    B, H = h_sc.shape
    Tc = hall_ref.shape[0] // B

    # Initialize the recurrent carry from the encoder state on the first chunk.
    @pl.when(chunk == 0)
    def _init():
        h_sc[...] = h0_ref[...]
        c_sc[...] = c0_ref[...]

    def step(t, carry):
        h, c = carry
        r = pl.multiple_of(t * B, B)
        # Only the recurrent matmul stays on the serial critical path.
        gates = gx_ref[pl.ds(r, B), :] + jnp.dot(
            h.astype(jnp.bfloat16), whh_ref[...],
            preferred_element_type=jnp.float32)                 # (B, 4H) f32
        i_g = jax.nn.sigmoid(gates[:, 0 * H:1 * H])
        f_g = jax.nn.sigmoid(gates[:, 1 * H:2 * H])
        g_g = jnp.tanh(gates[:, 2 * H:3 * H])
        o_g = jax.nn.sigmoid(gates[:, 3 * H:4 * H])
        c_new = f_g * c + i_g * g_g
        h_new = o_g * jnp.tanh(c_new)
        hall_ref[pl.ds(r, B), :] = h_new
        return h_new, c_new

    h_fin, c_fin = lax.fori_loop(0, Tc, step, (h_sc[...], c_sc[...]),
                                 unroll=True)

    # carry across chunks
    h_sc[...] = h_fin
    c_sc[...] = c_fin

    # emit the final state exactly once (saves vst slots on every other step)
    @pl.when(chunk == pl.num_programs(0) - 1)
    def _final():
        hout_ref[...] = h_fin
        cout_ref[...] = c_fin


def _output_proj_kernel(h_ref, wproj_ref, bproj_ref, logp_ref):
    """log_softmax(h @ W_proj + b_proj) over a (RB, H) row block."""
    logits = (
        jnp.dot(h_ref[...].astype(jnp.bfloat16), wproj_ref[...],
                preferred_element_type=jnp.float32)
        + bproj_ref[...]
    )                                                           # (RB, V) f32
    m = jnp.max(logits, axis=-1, keepdims=True)
    shifted = logits - m
    lse = jnp.log(jnp.sum(jnp.exp(shifted), axis=-1, keepdims=True))
    logp_ref[...] = shifted - lse


# ---------------------------------------------------------------------------
# Host-side helpers
# ---------------------------------------------------------------------------
def _pick_time_chunk(T, B, max_chunk=8):
    """Largest Tc <= max_chunk dividing T with a sublane-aligned (Tc*B) block."""
    for c in range(min(T, max_chunk), 0, -1):
        if T % c == 0 and ((c * B) % 8 == 0 or c == T):
            return c
    return T


def _pick_row_block(rows, cap=256):
    """Row block for the batched passes: full if small, else an aligned divisor."""
    if rows <= cap:
        return rows
    for d in range(cap, 7, -1):
        if rows % d == 0 and d % 8 == 0:
            return d
    return rows


def _vmem_limit(block_bytes):
    """Computed VMEM budget: 2x (double buffering) + margin, capped at 32 MiB."""
    return int(min(32 * 1024 * 1024,
                   max(8 * 1024 * 1024, 2 * block_bytes + 2 * 1024 * 1024)))


# ---------------------------------------------------------------------------
# Public API
# ---------------------------------------------------------------------------
@jax.jit
def decoder_decode(params, tokens, hidden):
    """Fused teacher-forced decode: T sequential PytorchDecoder.forward steps.

    tokens: (T, B) int32 token ids (step t uses tokens[t]).
    hidden: (h0, c0), each (1, B, H) -- PyTorch LSTM hidden layout.
    returns: (log_probs (T, B, V), (hT, cT) each (1, B, H))
    """
    h0, c0 = hidden
    T, B = tokens.shape
    H = h0.shape[-1]
    V, E = params["embedding"].shape
    G = 4 * H
    rows = T * B

    h_in = h0.reshape(B, H).astype(jnp.float32)
    c_in = c0.reshape(B, H).astype(jnp.float32)

    # ---- embedding lookup in the wrapper (XLA gather), bf16 into the MXU ----
    x_emb = jnp.take(params["embedding"], tokens.reshape(-1), axis=0)
    x_emb = x_emb.astype(jnp.bfloat16)                           # (T*B, E)

    # ---- Kernel A: batched input projection  gates_x = x @ W_ih + b ---------
    RB = _pick_row_block(rows)
    nr = rows // RB
    bytes_a = RB * E * 2 + E * G * 2 + G * 4 + RB * G * 4
    gates_x = pl.pallas_call(
        _input_proj_kernel,
        out_shape=jax.ShapeDtypeStruct((rows, G), jnp.float32),
        grid=(nr,),
        in_specs=[
            pl.BlockSpec((RB, E), lambda r: (r, 0)),     # x rows (pipelined)
            pl.BlockSpec((E, G), lambda r: (0, 0)),      # W_ih^T (resident)
            pl.BlockSpec((1, G), lambda r: (0, 0)),      # b_ih + b_hh
        ],
        out_specs=pl.BlockSpec((RB, G), lambda r: (r, 0)),
        compiler_params=pltpu.CompilerParams(
            dimension_semantics=("parallel",),
            vmem_limit_bytes=_vmem_limit(bytes_a),
        ),
    )(x_emb, params["w_ih"], params["b_gates"])

    # ---- Kernel B: sequential LSTM recurrence (only h @ W_hh inside) --------
    Tc = _pick_time_chunk(T, B)
    nc = T // Tc
    bytes_b = (Tc * B * G * 4 + H * G * 2 + 2 * B * H * 4
               + Tc * B * H * 4 + 2 * B * H * 4 + 2 * B * H * 4)
    h_all, h_fin, c_fin = pl.pallas_call(
        _lstm_recurrence_kernel,
        out_shape=(
            jax.ShapeDtypeStruct((rows, H), jnp.float32),   # per-step hidden
            jax.ShapeDtypeStruct((B, H), jnp.float32),      # final h
            jax.ShapeDtypeStruct((B, H), jnp.float32),      # final c
        ),
        grid=(nc,),
        in_specs=[
            pl.BlockSpec((Tc * B, G), lambda c: (c, 0)),    # gates_x chunk
            pl.BlockSpec((H, G), lambda c: (0, 0)),         # W_hh^T (resident)
            pl.BlockSpec((B, H), lambda c: (0, 0)),         # h0
            pl.BlockSpec((B, H), lambda c: (0, 0)),         # c0
        ],
        out_specs=(
            pl.BlockSpec((Tc * B, H), lambda c: (c, 0)),    # h_all chunk
            pl.BlockSpec((B, H), lambda c: (0, 0)),         # final h
            pl.BlockSpec((B, H), lambda c: (0, 0)),         # final c
        ),
        scratch_shapes=[
            pltpu.VMEM((B, H), jnp.float32),                # h carry
            pltpu.VMEM((B, H), jnp.float32),                # c carry
        ],
        compiler_params=pltpu.CompilerParams(
            dimension_semantics=("arbitrary",),             # true recurrence
            vmem_limit_bytes=_vmem_limit(bytes_b),
        ),
    )(gates_x, params["w_hh"], h_in, c_in)

    # ---- Kernel C: batched projection + log_softmax over all T*B rows -------
    bytes_c = RB * H * 4 + H * V * 2 + V * 4 + RB * V * 4
    logp = pl.pallas_call(
        _output_proj_kernel,
        out_shape=jax.ShapeDtypeStruct((rows, V), jnp.float32),
        grid=(nr,),
        in_specs=[
            pl.BlockSpec((RB, H), lambda r: (r, 0)),        # h rows (pipelined)
            pl.BlockSpec((H, V), lambda r: (0, 0)),         # W_proj^T (resident)
            pl.BlockSpec((1, V), lambda r: (0, 0)),         # b_proj
        ],
        out_specs=pl.BlockSpec((RB, V), lambda r: (r, 0)),
        compiler_params=pltpu.CompilerParams(
            dimension_semantics=("parallel",),
            vmem_limit_bytes=_vmem_limit(bytes_c),
        ),
    )(h_all, params["w_proj"], params["b_proj"])

    return (logp.reshape(T, B, V),
            (h_fin.reshape(1, B, H), c_fin.reshape(1, B, H)))


def decoder_forward(params, x_tokens, hidden):
    """Single-step API matching PytorchDecoder.forward.

    x_tokens: (B, 1) int32 (previous prediction / teacher-forced token)
    hidden:   (h0, c0), each (1, B, H)
    returns:  (log_probs (B, V), (h1, c1) each (1, B, H))
    """
    B = x_tokens.shape[0]
    tokens = x_tokens.reshape(B).reshape(1, B).astype(jnp.int32)   # (T=1, B)
    logp_seq, hidden_new = decoder_decode(params, tokens, hidden)
    return logp_seq[0], hidden_new


def init_decoder_params(key, vocab_len, embedding_dim, hidden_size):
    """Synthetic parameters matching PytorchDecoder.__init__ shapes.

    PyTorch stores W_ih as (4H, E) / W_hh as (4H, H); we keep the transposed
    (in, out) layout so the kernels compute x @ W directly on the MXU, and the
    matmul weights in bf16 (f32 accumulation happens inside the kernels).
    Gate order along the 4H axis follows PyTorch: [input | forget | g | output].
    """
    ks = jax.random.split(key, 6)
    s = 0.1
    return {
        "embedding": s * jax.random.normal(ks[0], (vocab_len, embedding_dim), jnp.float32),
        "w_ih": (s * jax.random.normal(ks[1], (embedding_dim, 4 * hidden_size),
                                       jnp.float32)).astype(jnp.bfloat16),
        "w_hh": (s * jax.random.normal(ks[2], (hidden_size, 4 * hidden_size),
                                       jnp.float32)).astype(jnp.bfloat16),
        # combined bias = b_ih + b_hh (kept as a single (1, 4H) f32 row)
        "b_gates": s * jax.random.normal(ks[3], (1, 4 * hidden_size), jnp.float32),
        "w_proj": (s * jax.random.normal(ks[4], (hidden_size, vocab_len),
                                         jnp.float32)).astype(jnp.bfloat16),
        "b_proj": s * jax.random.normal(ks[5], (1, vocab_len), jnp.float32),
    }


def _reference_decode(params, tokens, hidden):
    """Plain-JAX reference: T applications of the PyTorch LSTM-cell decoder
    step with the same bf16-weights / f32-accumulate mixed precision."""
    h0, c0 = hidden
    T, B = tokens.shape
    H = h0.shape[-1]
    h = h0.reshape(B, H)
    c = c0.reshape(B, H)
    logps = []
    for t in range(T):
        x = jnp.take(params["embedding"], tokens[t], axis=0).astype(jnp.bfloat16)
        gates = (jnp.dot(x, params["w_ih"], preferred_element_type=jnp.float32)
                 + jnp.dot(h.astype(jnp.bfloat16), params["w_hh"],
                           preferred_element_type=jnp.float32)
                 + params["b_gates"])
        i_g, f_g, g_g, o_g = jnp.split(gates, 4, axis=-1)
        i_g = jax.nn.sigmoid(i_g)
        f_g = jax.nn.sigmoid(f_g)
        g_g = jnp.tanh(g_g)
        o_g = jax.nn.sigmoid(o_g)
        c = f_g * c + i_g * g_g
        h = o_g * jnp.tanh(c)
        logits = (jnp.dot(h.astype(jnp.bfloat16), params["w_proj"],
                          preferred_element_type=jnp.float32)
                  + params["b_proj"])
        logps.append(jax.nn.log_softmax(logits, axis=-1))
    return jnp.stack(logps, axis=0), (h.reshape(1, B, H), c.reshape(1, B, H))


if __name__ == "__main__":
    # Small but lane/sublane-aligned demo sizes (H, E multiples of 128; V=256).
    BATCH = 8
    VOCAB_LEN = 256
    EMBED_DIM = 128
    HIDDEN = 128
    STEPS = 4

    key = jax.random.PRNGKey(0)
    k_params, k_tok, k_h, k_c = jax.random.split(key, 4)

    params = init_decoder_params(k_params, VOCAB_LEN, EMBED_DIM, HIDDEN)
    tokens = jax.random.randint(k_tok, (STEPS, BATCH), 0, VOCAB_LEN, dtype=jnp.int32)
    h0 = 0.1 * jax.random.normal(k_h, (1, BATCH, HIDDEN), jnp.float32)
    c0 = 0.1 * jax.random.normal(k_c, (1, BATCH, HIDDEN), jnp.float32)

    # Fused multi-step (teacher-forced) decode.
    log_probs, (h1, c1) = decoder_decode(params, tokens, (h0, c0))
    jax.block_until_ready((log_probs, h1, c1))

    ref_logp, (ref_h1, ref_c1) = _reference_decode(params, tokens, (h0, c0))
    assert log_probs.shape == (STEPS, BATCH, VOCAB_LEN)
    assert h1.shape == (1, BATCH, HIDDEN) and c1.shape == (1, BATCH, HIDDEN)
    assert jnp.allclose(log_probs, ref_logp, atol=2e-3, rtol=2e-3), \
        float(jnp.max(jnp.abs(log_probs - ref_logp)))
    assert jnp.allclose(h1, ref_h1, atol=2e-3, rtol=2e-3)
    assert jnp.allclose(c1, ref_c1, atol=2e-3, rtol=2e-3)

    # Single-step API (exactly the PytorchDecoder.forward signature semantics).
    x_step = tokens[0].reshape(BATCH, 1)
    logp_1, (h_s, c_s) = decoder_forward(params, x_step, (h0, c0))
    jax.block_until_ready((logp_1, h_s, c_s))
    assert logp_1.shape == (BATCH, VOCAB_LEN)
    assert jnp.allclose(logp_1, ref_logp[0], atol=2e-3, rtol=2e-3)

    print("KERNEL_OK")
</pallas_src>

<mosaic_0001>
module attributes {stable_mosaic.version = 11 : i64} {
  func.func @_input_proj_kernel(%arg0: i32, %arg1: memref<32x128xbf16, #tpu.memory_space<vmem>>, %arg2: memref<128x512xbf16, #tpu.memory_space<vmem>>, %arg3: memref<1x512xf32, #tpu.memory_space<vmem>>, %arg4: memref<32x512xf32, #tpu.memory_space<vmem>>) attributes {dimension_semantics = [#tpu.dimension_semantics<parallel>], iteration_bounds = array<i64: 1>, scalar_prefetch = 0 : i64, scratch_operands = 0 : i64, tpu.core_type = #tpu.core_type<tc>, window_params = [{transform_indices = @transform_0, window_bounds = array<i64: 32, 128>}, {pipeline_mode = #tpu.pipeline_mode<synchronous>, transform_indices = @transform_1, window_bounds = array<i64: 128, 512>}, {pipeline_mode = #tpu.pipeline_mode<synchronous>, transform_indices = @transform_2, window_bounds = array<i64: 1, 512>}, {transform_indices = @transform_3, window_bounds = array<i64: 32, 512>}]} {
    %c0 = arith.constant 0 : index
    %c0_0 = arith.constant 0 : index
    %0 = vector.load %arg1[%c0, %c0_0] : memref<32x128xbf16, #tpu.memory_space<vmem>>, vector<32x128xbf16>
    %c0_1 = arith.constant 0 : index
    %c0_2 = arith.constant 0 : index
    %1 = vector.load %arg2[%c0_1, %c0_2] : memref<128x512xbf16, #tpu.memory_space<vmem>>, vector<128x512xbf16>
    %cst = arith.constant dense<0.000000e+00> : vector<32x512xf32>
    %2 = tpu.matmul %0, %1, %cst {dimension_numbers = #tpu.dot_dimension_numbers<[1], [0], [0], [1], [0, 0, 1, 1], [], []>} : vector<32x128xbf16>, vector<128x512xbf16>, vector<32x512xf32> -> vector<32x512xf32>
    %c0_3 = arith.constant 0 : index
    %c0_4 = arith.constant 0 : index
    %3 = vector.load %arg3[%c0_3, %c0_4] : memref<1x512xf32, #tpu.memory_space<vmem>>, vector<1x512xf32>
    %4 = vector.broadcast %3 : vector<1x512xf32> to vector<32x512xf32>
    %5 = arith.addf %2, %4 : vector<32x512xf32>
    %c0_5 = arith.constant 0 : index
    %c0_6 = arith.constant 0 : index
    %6 = vector.load %arg4[%c0_5, %c0_6] : memref<32x512xf32, #tpu.memory_space<vmem>>, vector<32x512xf32>
    tpu.vector_store %arg4[%c0_5, %c0_6], %5 {strides = array<i32>} : memref<32x512xf32, #tpu.memory_space<vmem>>, vector<32x512xf32>,
    return
  }
  func.func @transform_0(%arg0: i32) -> (i32, i32) {
    %c0_i32 = arith.constant 0 : i32
    %c0_i32_0 = arith.constant 0 : i32
    return %arg0, %c0_i32 : i32, i32
  }
  func.func @transform_1(%arg0: i32) -> (i32, i32) {
    %c0_i32 = arith.constant 0 : i32
    %c0_i32_0 = arith.constant 0 : i32
    %c0_i32_1 = arith.constant 0 : i32
    return %c0_i32, %c0_i32_0 : i32, i32
  }
  func.func @transform_2(%arg0: i32) -> (i32, i32) {
    %c0_i32 = arith.constant 0 : i32
    %c0_i32_0 = arith.constant 0 : i32
    %c0_i32_1 = arith.constant 0 : i32
    return %c0_i32, %c0_i32_0 : i32, i32
  }
  func.func @transform_3(%arg0: i32) -> (i32, i32) {
    %c0_i32 = arith.constant 0 : i32
    %c0_i32_0 = arith.constant 0 : i32
    return %arg0, %c0_i32 : i32, i32
  }
}

module attributes {stable_mosaic.version = 11 : i64} {
  func.func @_lstm_recurrence_kernel(%arg0: i32, %arg1: memref<32x512xf32, #tpu.memory_space<vmem>>, %arg2: memref<128x512xbf16, #tpu.memory_space<vmem>>, %arg3: memref<8x128xf32, #tpu.memory_space<vmem>>, %arg4: memref<8x128xf32, #tpu.memory_space<vmem>>, %arg5: memref<32x128xf32, #tpu.memory_space<vmem>>, %arg6: memref<8x128xf32, #tpu.memory_space<vmem>>, %arg7: memref<8x128xf32, #tpu.memory_space<vmem>>, %arg8: memref<8x128xf32, #tpu.memory_space<vmem>>, %arg9: memref<8x128xf32, #tpu.memory_space<vmem>>) attributes {dimension_semantics = [#tpu.dimension_semantics<arbitrary>], iteration_bounds = array<i64: 1>, scalar_prefetch = 0 : i64, scratch_operands = 2 : i64, tpu.core_type = #tpu.core_type<tc>, window_params = [{transform_indices = @transform_0, window_bounds = array<i64: 32, 512>}, {pipeline_mode = #tpu.pipeline_mode<synchronous>, transform_indices = @transform_1, window_bounds = array<i64: 128, 512>}, {pipeline_mode = #tpu.pipeline_mode<synchronous>, transform_indices = @transform_2, window_bounds = array<i64: 8, 128>}, {pipeline_mode = #tpu.pipeline_mode<synchronous>, transform_indices = @transform_3, window_bounds = array<i64: 8, 128>}, {transform_indices = @transform_4, window_bounds = array<i64: 32, 128>}, {pipeline_mode = #tpu.pipeline_mode<synchronous>, transform_indices = @transform_5, window_bounds = array<i64: 8, 128>}, {pipeline_mode = #tpu.pipeline_mode<synchronous>, transform_indices = @transform_6, window_bounds = array<i64: 8, 128>}]} {
    %c0_i32 = arith.constant 0 : i32
    %0 = arith.cmpi eq, %arg0, %c0_i32 : i32
    %1 = arith.extui %0 : i1 to i32
    %c0_i32_0 = arith.constant 0 : i32
    %2 = arith.cmpi ne, %1, %c0_i32_0 : i32
    scf.if %2 {
      %c0_45 = arith.constant 0 : index
      %c0_46 = arith.constant 0 : index
      %150 = vector.load %arg3[%c0_45, %c0_46] : memref<8x128xf32, #tpu.memory_space<vmem>>, vector<8x128xf32>
      %c0_47 = arith.constant 0 : index
      %c0_48 = arith.constant 0 : index
      %151 = vector.load %arg8[%c0_47, %c0_48] : memref<8x128xf32, #tpu.memory_space<vmem>>, vector<8x128xf32>
      tpu.vector_store %arg8[%c0_47, %c0_48], %150 {strides = array<i32>} : memref<8x128xf32, #tpu.memory_space<vmem>>, vector<8x128xf32>,
      %c0_49 = arith.constant 0 : index
      %c0_50 = arith.constant 0 : index
      %152 = vector.load %arg4[%c0_49, %c0_50] : memref<8x128xf32, #tpu.memory_space<vmem>>, vector<8x128xf32>
      %c0_51 = arith.constant 0 : index
      %c0_52 = arith.constant 0 : index
      %153 = vector.load %arg9[%c0_51, %c0_52] : memref<8x128xf32, #tpu.memory_space<vmem>>, vector<8x128xf32>
      tpu.vector_store %arg9[%c0_51, %c0_52], %152 {strides = array<i32>} : memref<8x128xf32, #tpu.memory_space<vmem>>, vector<8x128xf32>,
    } else {
    }
    %c0 = arith.constant 0 : index
    %c0_1 = arith.constant 0 : index
    %3 = vector.load %arg8[%c0, %c0_1] : memref<8x128xf32, #tpu.memory_space<vmem>>, vector<8x128xf32>
    %c0_2 = arith.constant 0 : index
    %c0_3 = arith.constant 0 : index
    %4 = vector.load %arg9[%c0_2, %c0_3] : memref<8x128xf32, #tpu.memory_space<vmem>>, vector<8x128xf32>
    %c0_i32_4 = arith.constant 0 : i32
    %c8_i32 = arith.constant 8 : i32
    %5 = arith.muli %c0_i32_4, %c8_i32 : i32
    %6 = tpu.assume_multiple %5, 8 : i32
    %7 = arith.index_cast %6 : i32 to index
    %c0_5 = arith.constant 0 : index
    %8 = vector.load %arg1[%7, %c0_5] : memref<32x512xf32, #tpu.memory_space<vmem>>, vector<8x512xf32>
    %9 = arith.truncf %3 : vector<8x128xf32> to vector<8x128xbf16>
    %c0_6 = arith.constant 0 : index
    %c0_7 = arith.constant 0 : index
    %10 = vector.load %arg2[%c0_6, %c0_7] : memref<128x512xbf16, #tpu.memory_space<vmem>>, vector<128x512xbf16>
    %cst = arith.constant dense<0.000000e+00> : vector<8x512xf32>
    %11 = tpu.matmul %9, %10, %cst {dimension_numbers = #tpu.dot_dimension_numbers<[1], [0], [0], [1], [0, 0, 1, 1], [], []>} : vector<8x128xbf16>, vector<128x512xbf16>, vector<8x512xf32> -> vector<8x512xf32>
    %12 = arith.addf %8, %11 : vector<8x512xf32>
    %13 = vector.extract_strided_slice %12 {offsets = [0, 0], sizes = [8, 128], strides = [1, 1]} : vector<8x512xf32> to vector<8x128xf32>
    %14 = arith.negf %13 : vector<8x128xf32>
    %15 = math.exp %14 : vector<8x128xf32>
    %cst_8 = arith.constant 1.000000e+00 : f32
    %16 = vector.broadcast %cst_8 : f32 to vector<8x128xf32>
    %17 = arith.addf %16, %15 : vector<8x128xf32>
    %18 = arith.divf %16, %17 : vector<8x128xf32>
    %19 = vector.extract_strided_slice %12 {offsets = [0, 128], sizes = [8, 128], strides = [1, 1]} : vector<8x512xf32> to vector<8x128xf32>
    %20 = arith.negf %19 : vector<8x128xf32>
    %21 = math.exp %20 : vector<8x128xf32>
    %cst_9 = arith.constant 1.000000e+00 : f32
    %22 = vector.broadcast %cst_9 : f32 to vector<8x128xf32>
    %23 = arith.addf %22, %21 : vector<8x128xf32>
    %24 = arith.divf %22, %23 : vector<8x128xf32>
    %25 = vector.extract_strided_slice %12 {offsets = [0, 256], sizes = [8, 128], strides = [1, 1]} : vector<8x512xf32> to vector<8x128xf32>
    %26 = math.tanh %25 : vector<8x128xf32>
    %27 = vector.extract_strided_slice %12 {offsets = [0, 384], sizes = [8, 128], strides = [1, 1]} : vector<8x512xf32> to vector<8x128xf32>
    %28 = arith.negf %27 : vector<8x128xf32>
    %29 = math.exp %28 : vector<8x128xf32>
    %cst_10 = arith.constant 1.000000e+00 : f32
    %30 = vector.broadcast %cst_10 : f32 to vector<8x128xf32>
    %31 = arith.addf %30, %29 : vector<8x128xf32>
    %32 = arith.divf %30, %31 : vector<8x128xf32>
    %33 = arith.mulf %24, %4 : vector<8x128xf32>
    %34 = arith.mulf %18, %26 : vector<8x128xf32>
    %35 = arith.addf %33, %34 : vector<8x128xf32>
    %36 = math.tanh %35 : vector<8x128xf32>
    %37 = arith.mulf %32, %36 : vector<8x128xf32>
    %38 = arith.index_cast %6 : i32 to index
    %c0_11 = arith.constant 0 : index
    %39 = vector.load %arg5[%38, %c0_11] : memref<32x128xf32, #tpu.memory_space<vmem>>, vector<8x128xf32>
    tpu.vector_store %arg5[%38, %c0_11], %37 {strides = array<i32>} : memref<32x128xf32, #tpu.memory_space<vmem>>, vector<8x128xf32>,
    %c1_i32 = arith.constant 1 : i32
    %c8_i32_12 = arith.constant 8 : i32
    %40 = arith.muli %c1_i32, %c8_i32_12 : i32
    %41 = tpu.assume_multiple %40, 8 : i32
    %42 = arith.index_cast %41 : i32 to index
    %c0_13 = arith.constant 0 : index
    %43 = vector.load %arg1[%42, %c0_13] : memref<32x512xf32, #tpu.memory_space<vmem>>, vector<8x512xf32>
    %44 = arith.truncf %37 : vector<8x128xf32> to vector<8x128xbf16>
    %c0_14 = arith.constant 0 : index
    %c0_15 = arith.constant 0 : index
    %45 = vector.load %arg2[%c0_14, %c0_15] : memref<128x512xbf16, #tpu.memory_space<vmem>>, vector<128x512xbf16>
    %cst_16 = arith.constant dense<0.000000e+00> : vector<8x512xf32>
    %46 = tpu.matmul %44, %45, %cst_16 {dimension_numbers = #tpu.dot_dimension_numbers<[1], [0], [0], [1], [0, 0, 1, 1], [], []>} : vector<8x128xbf16>, vector<128x512xbf16>, vector<8x512xf32> -> vector<8x512xf32>
    %47 = arith.addf %43, %46 : vector<8x512xf32>
    %48 = vector.extract_strided_slice %47 {offsets = [0, 0], sizes = [8, 128], strides = [1, 1]} : vector<8x512xf32> to vector<8x128xf32>
    %49 = arith.negf %48 : vector<8x128xf32>
    %50 = math.exp %49 : vector<8x128xf32>
    %cst_17 = arith.constant 1.000000e+00 : f32
    %51 = vector.broadcast %cst_17 : f32 to vector<8x128xf32>
    %52 = arith.addf %51, %50 : vector<8x128xf32>
    %53 = arith.divf %51, %52 : vector<8x128xf32>
    %54 = vector.extract_strided_slice %47 {offsets = [0, 128], sizes = [8, 128], strides = [1, 1]} : vector<8x512xf32> to vector<8x128xf32>
    %55 = arith.negf %54 : vector<8x128xf32>
    %56 = math.exp %55 : vector<8x128xf32>
    %cst_18 = arith.constant 1.000000e+00 : f32
    %57 = vector.broadcast %cst_18 : f32 to vector<8x128xf32>
    %58 = arith.addf %57, %56 : vector<8x128xf32>
    %59 = arith.divf %57, %58 : vector<8x128xf32>
    %60 = vector.extract_strided_slice %47 {offsets = [0, 256], sizes = [8, 128], strides = [1, 1]} : vector<8x512xf32> to vector<8x128xf32>
    %61 = math.tanh %60 : vector<8x128xf32>
    %62 = vector.extract_strided_slice %47 {offsets = [0, 384], sizes = [8, 128], strides = [1, 1]} : vector<8x512xf32> to vector<8x128xf32>
    %63 = arith.negf %62 : vector<8x128xf32>
    %64 = math.exp %63 : vector<8x128xf32>
    %cst_19 = arith.constant 1.000000e+00 : f32
    %65 = vector.broadcast %cst_19 : f32 to vector<8x128xf32>
    %66 = arith.addf %65, %64 : vector<8x128xf32>
    %67 = arith.divf %65, %66 : vector<8x128xf32>
    %68 = arith.mulf %59, %35 : vector<8x128xf32>
    %69 = arith.mulf %53, %61 : vector<8x128xf32>
    %70 = arith.addf %68, %69 : vector<8x128xf32>
    %71 = math.tanh %70 : vector<8x128xf32>
    %72 = arith.mulf %67, %71 : vector<8x128xf32>
    %73 = arith.index_cast %41 : i32 to index
    %c0_20 = arith.constant 0 : index
    %74 = vector.load %arg5[%73, %c0_20] : memref<32x128xf32, #tpu.memory_space<vmem>>, vector<8x128xf32>
    tpu.vector_store %arg5[%73, %c0_20], %72 {strides = array<i32>} : memref<32x128xf32, #tpu.memory_space<vmem>>, vector<8x128xf32>,
    %c2_i32 = arith.constant 2 : i32
    %c8_i32_21 = arith.constant 8 : i32
    %75 = arith.muli %c2_i32, %c8_i32_21 : i32
    %76 = tpu.assume_multiple %75, 8 : i32
    %77 = arith.index_cast %76 : i32 to index
    %c0_22 = arith.constant 0 : index
    %78 = vector.load %arg1[%77, %c0_22] : memref<32x512xf32, #tpu.memory_space<vmem>>, vector<8x512xf32>
    %79 = arith.truncf %72 : vector<8x128xf32> to vector<8x128xbf16>
    %c0_23 = arith.constant 0 : index
    %c0_24 = arith.constant 0 : index
    %80 = vector.load %arg2[%c0_23, %c0_24] : memref<128x512xbf16, #tpu.memory_space<vmem>>, vector<128x512xbf16>
    %cst_25 = arith.constant dense<0.000000e+00> : vector<8x512xf32>
    %81 = tpu.matmul %79, %80, %cst_25 {dimension_numbers = #tpu.dot_dimension_numbers<[1], [0], [0], [1], [0, 0, 1, 1], [], []>} : vector<8x128xbf16>, vector<128x512xbf16>, vector<8x512xf32> -> vector<8x512xf32>
    %82 = arith.addf %78, %81 : vector<8x512xf32>
    %83 = vector.extract_strided_slice %82 {offsets = [0, 0], sizes = [8, 128], strides = [1, 1]} : vector<8x512xf32> to vector<8x128xf32>
    %84 = arith.negf %83 : vector<8x128xf32>
    %85 = math.exp %84 : vector<8x128xf32>
    %cst_26 = arith.constant 1.000000e+00 : f32
    %86 = vector.broadcast %cst_26 : f32 to vector<8x128xf32>
    %87 = arith.addf %86, %85 : vector<8x128xf32>
    %88 = arith.divf %86, %87 : vector<8x128xf32>
    %89 = vector.extract_strided_slice %82 {offsets = [0, 128], sizes = [8, 128], strides = [1, 1]} : vector<8x512xf32> to vector<8x128xf32>
    %90 = arith.negf %89 : vector<8x128xf32>
    %91 = math.exp %90 : vector<8x128xf32>
    %cst_27 = arith.constant 1.000000e+00 : f32
    %92 = vector.broadcast %cst_27 : f32 to vector<8x128xf32>
    %93 = arith.addf %92, %91 : vector<8x128xf32>
    %94 = arith.divf %92, %93 : vector<8x128xf32>
    %95 = vector.extract_strided_slice %82 {offsets = [0, 256], sizes = [8, 128], strides = [1, 1]} : vector<8x512xf32> to vector<8x128xf32>
    %96 = math.tanh %95 : vector<8x128xf32>
    %97 = vector.extract_strided_slice %82 {offsets = [0, 384], sizes = [8, 128], strides = [1, 1]} : vector<8x512xf32> to vector<8x128xf32>
    %98 = arith.negf %97 : vector<8x128xf32>
    %99 = math.exp %98 : vector<8x128xf32>
    %cst_28 = arith.constant 1.000000e+00 : f32
    %100 = vector.broadcast %cst_28 : f32 to vector<8x128xf32>
    %101 = arith.addf %100, %99 : vector<8x128xf32>
    %102 = arith.divf %100, %101 : vector<8x128xf32>
    %103 = arith.mulf %94, %70 : vector<8x128xf32>
    %104 = arith.mulf %88, %96 : vector<8x128xf32>
    %105 = arith.addf %103, %104 : vector<8x128xf32>
    %106 = math.tanh %105 : vector<8x128xf32>
    %107 = arith.mulf %102, %106 : vector<8x128xf32>
    %108 = arith.index_cast %76 : i32 to index
    %c0_29 = arith.constant 0 : index
    %109 = vector.load %arg5[%108, %c0_29] : memref<32x128xf32, #tpu.memory_space<vmem>>, vector<8x128xf32>
    tpu.vector_store %arg5[%108, %c0_29], %107 {strides = array<i32>} : memref<32x128xf32, #tpu.memory_space<vmem>>, vector<8x128xf32>,
    %c3_i32 = arith.constant 3 : i32
    %c8_i32_30 = arith.constant 8 : i32
    %110 = arith.muli %c3_i32, %c8_i32_30 : i32
    %111 = tpu.assume_multiple %110, 8 : i32
    %112 = arith.index_cast %111 : i32 to index
    %c0_31 = arith.constant 0 : index
    %113 = vector.load %arg1[%112, %c0_31] : memref<32x512xf32, #tpu.memory_space<vmem>>, vector<8x512xf32>
    %114 = arith.truncf %107 : vector<8x128xf32> to vector<8x128xbf16>
    %c0_32 = arith.constant 0 : index
    %c0_33 = arith.constant 0 : index
    %115 = vector.load %arg2[%c0_32, %c0_33] : memref<128x512xbf16, #tpu.memory_space<vmem>>, vector<128x512xbf16>
    %cst_34 = arith.constant dense<0.000000e+00> : vector<8x512xf32>
    %116 = tpu.matmul %114, %115, %cst_34 {dimension_numbers = #tpu.dot_dimension_numbers<[1], [0], [0], [1], [0, 0, 1, 1], [], []>} : vector<8x128xbf16>, vector<128x512xbf16>, vector<8x512xf32> -> vector<8x512xf32>
    %117 = arith.addf %113, %116 : vector<8x512xf32>
    %118 = vector.extract_strided_slice %117 {offsets = [0, 0], sizes = [8, 128], strides = [1, 1]} : vector<8x512xf32> to vector<8x128xf32>
    %119 = arith.negf %118 : vector<8x128xf32>
    %120 = math.exp %119 : vector<8x128xf32>
    %cst_35 = arith.constant 1.000000e+00 : f32
    %121 = vector.broadcast %cst_35 : f32 to vector<8x128xf32>
    %122 = arith.addf %121, %120 : vector<8x128xf32>
    %123 = arith.divf %121, %122 : vector<8x128xf32>
    %124 = vector.extract_strided_slice %117 {offsets = [0, 128], sizes = [8, 128], strides = [1, 1]} : vector<8x512xf32> to vector<8x128xf32>
    %125 = arith.negf %124 : vector<8x128xf32>
    %126 = math.exp %125 : vector<8x128xf32>
    %cst_36 = arith.constant 1.000000e+00 : f32
    %127 = vector.broadcast %cst_36 : f32 to vector<8x128xf32>
    %128 = arith.addf %127, %126 : vector<8x128xf32>
    %129 = arith.divf %127, %128 : vector<8x128xf32>
    %130 = vector.extract_strided_slice %117 {offsets = [0, 256], sizes = [8, 128], strides = [1, 1]} : vector<8x512xf32> to vector<8x128xf32>
    %131 = math.tanh %130 : vector<8x128xf32>
    %132 = vector.extract_strided_slice %117 {offsets = [0, 384], sizes = [8, 128], strides = [1, 1]} : vector<8x512xf32> to vector<8x128xf32>
    %133 = arith.negf %132 : vector<8x128xf32>
    %134 = math.exp %133 : vector<8x128xf32>
    %cst_37 = arith.constant 1.000000e+00 : f32
    %135 = vector.broadcast %cst_37 : f32 to vector<8x128xf32>
    %136 = arith.addf %135, %134 : vector<8x128xf32>
    %137 = arith.divf %135, %136 : vector<8x128xf32>
    %138 = arith.mulf %129, %105 : vector<8x128xf32>
    %139 = arith.mulf %123, %131 : vector<8x128xf32>
    %140 = arith.addf %138, %139 : vector<8x128xf32>
    %141 = math.tanh %140 : vector<8x128xf32>
    %142 = arith.mulf %137, %141 : vector<8x128xf32>
    %143 = arith.index_cast %111 : i32 to index
    %c0_38 = arith.constant 0 : index
    %144 = vector.load %arg5[%143, %c0_38] : memref<32x128xf32, #tpu.memory_space<vmem>>, vector<8x128xf32>
    tpu.vector_store %arg5[%143, %c0_38], %142 {strides = array<i32>} : memref<32x128xf32, #tpu.memory_space<vmem>>, vector<8x128xf32>,
    %c4_i32 = arith.constant 4 : i32
    %c0_39 = arith.constant 0 : index
    %c0_40 = arith.constant 0 : index
    %145 = vector.load %arg8[%c0_39, %c0_40] : memref<8x128xf32, #tpu.memory_space<vmem>>, vector<8x128xf32>
    tpu.vector_store %arg8[%c0_39, %c0_40], %142 {strides = array<i32>} : memref<8x128xf32, #tpu.memory_space<vmem>>, vector<8x128xf32>,
    %c0_41 = arith.constant 0 : index
    %c0_42 = arith.constant 0 : index
    %146 = vector.load %arg9[%c0_41, %c0_42] : memref<8x128xf32, #tpu.memory_space<vmem>>, vector<8x128xf32>
    tpu.vector_store %arg9[%c0_41, %c0_42], %140 {strides = array<i32>} : memref<8x128xf32, #tpu.memory_space<vmem>>, vector<8x128xf32>,
    %c0_i32_43 = arith.constant 0 : i32
    %147 = arith.cmpi eq, %arg0, %c0_i32_43 : i32
    %148 = arith.extui %147 : i1 to i32
    %c0_i32_44 = arith.constant 0 : i32
    %149 = arith.cmpi ne, %148, %c0_i32_44 : i32
    scf.if %149 {
      %c0_45 = arith.constant 0 : index
      %c0_46 = arith.constant 0 : index
      %150 = vector.load %arg6[%c0_45, %c0_46] : memref<8x128xf32, #tpu.memory_space<vmem>>, vector<8x128xf32>
      tpu.vector_store %arg6[%c0_45, %c0_46], %142 {strides = array<i32>} : memref<8x128xf32, #tpu.memory_space<vmem>>, vector<8x128xf32>,
      %c0_47 = arith.constant 0 : index
      %c0_48 = arith.constant 0 : index
      %151 = vector.load %arg7[%c0_47, %c0_48] : memref<8x128xf32, #tpu.memory_space<vmem>>, vector<8x128xf32>
      tpu.vector_store %arg7[%c0_47, %c0_48], %140 {strides = array<i32>} : memref<8x128xf32, #tpu.memory_space<vmem>>, vector<8x128xf32>,
    } else {
    }
    return
  }
  func.func @transform_0(%arg0: i32) -> (i32, i32) {
    %c0_i32 = arith.constant 0 : i32
    %c0_i32_0 = arith.constant 0 : i32
    return %arg0, %c0_i32 : i32, i32
  }
  func.func @transform_1(%arg0: i32) -> (i32, i32) {
    %c0_i32 = arith.constant 0 : i32
    %c0_i32_0 = arith.constant 0 : i32
    %c0_i32_1 = arith.constant 0 : i32
    return %c0_i32, %c0_i32_0 : i32, i32
  }
  func.func @transform_2(%arg0: i32) -> (i32, i32) {
    %c0_i32 = arith.constant 0 : i32
    %c0_i32_0 = arith.constant 0 : i32
    %c0_i32_1 = arith.constant 0 : i32
    return %c0_i32, %c0_i32_0 : i32, i32
  }
  func.func @transform_3(%arg0: i32) -> (i32, i32) {
    %c0_i32 = arith.constant 0 : i32
    %c0_i32_0 = arith.constant 0 : i32
    %c0_i32_1 = arith.constant 0 : i32
    return %c0_i32, %c0_i32_0 : i32, i32
  }
  func.func @transform_4(%arg0: i32) -> (i32, i32) {
    %c0_i32 = arith.constant 0 : i32
    %c0_i32_0 = arith.constant 0 : i32
    return %arg0, %c0_i32 : i32, i32
  }
  func.func @transform_5(%arg0: i32) -> (i32, i32) {
    %c0_i32 = arith.constant 0 : i32
    %c0_i32_0 = arith.constant 0 : i32
    %c0_i32_1 = arith.constant 0 : i32
    return %c0_i32, %c0_i32_0 : i32, i32
  }
  func.func @transform_6(%arg0: i32) -> (i32, i32) {
    %c0_i32 = arith.constant 0 : i32
    %c0_i32_0 = arith.constant 0 : i32
    %c0_i32_1 = arith.constant 0 : i32
    return %c0_i32, %c0_i32_0 : i32, i32
  }
}

module attributes {stable_mosaic.version = 11 : i64} {
  func.func @_output_proj_kernel(%arg0: i32, %arg1: memref<32x128xf32, #tpu.memory_space<vmem>>, %arg2: memref<128x256xbf16, #tpu.memory_space<vmem>>, %arg3: memref<1x256xf32, #tpu.memory_space<vmem>>, %arg4: memref<32x256xf32, #tpu.memory_space<vmem>>) attributes {dimension_semantics = [#tpu.dimension_semantics<parallel>], iteration_bounds = array<i64: 1>, scalar_prefetch = 0 : i64, scratch_operands = 0 : i64, tpu.core_type = #tpu.core_type<tc>, window_params = [{transform_indices = @transform_0, window_bounds = array<i64: 32, 128>}, {pipeline_mode = #tpu.pipeline_mode<synchronous>, transform_indices = @transform_1, window_bounds = array<i64: 128, 256>}, {pipeline_mode = #tpu.pipeline_mode<synchronous>, transform_indices = @transform_2, window_bounds = array<i64: 1, 256>}, {transform_indices = @transform_3, window_bounds = array<i64: 32, 256>}]} {
    %c0 = arith.constant 0 : index
    %c0_0 = arith.constant 0 : index
    %0 = vector.load %arg1[%c0, %c0_0] : memref<32x128xf32, #tpu.memory_space<vmem>>, vector<32x128xf32>
    %1 = arith.truncf %0 : vector<32x128xf32> to vector<32x128xbf16>
    %c0_1 = arith.constant 0 : index
    %c0_2 = arith.constant 0 : index
    %2 = vector.load %arg2[%c0_1, %c0_2] : memref<128x256xbf16, #tpu.memory_space<vmem>>, vector<128x256xbf16>
    %cst = arith.constant dense<0.000000e+00> : vector<32x256xf32>
    %3 = tpu.matmul %1, %2, %cst {dimension_numbers = #tpu.dot_dimension_numbers<[1], [0], [0], [1], [0, 0, 1, 1], [], []>} : vector<32x128xbf16>, vector<128x256xbf16>, vector<32x256xf32> -> vector<32x256xf32>
    %c0_3 = arith.constant 0 : index
    %c0_4 = arith.constant 0 : index
    %4 = vector.load %arg3[%c0_3, %c0_4] : memref<1x256xf32, #tpu.memory_space<vmem>>, vector<1x256xf32>
    %5 = vector.broadcast %4 : vector<1x256xf32> to vector<32x256xf32>
    %6 = arith.addf %3, %5 : vector<32x256xf32>
    %cst_5 = arith.constant dense<0xFF800000> : vector<32xf32>
    %7 = vector.multi_reduction <maximumf>, %6, %cst_5 [1] : vector<32x256xf32> to vector<32xf32>
    %8 = vector.shape_cast %7 : vector<32xf32> to vector<32x1xf32>
    %9 = vector.broadcast %8 : vector<32x1xf32> to vector<32x256xf32>
    %10 = arith.subf %6, %9 : vector<32x256xf32>
    %11 = math.exp %10 : vector<32x256xf32>
    %cst_6 = arith.constant dense<0.000000e+00> : vector<32xf32>
    %12 = vector.multi_reduction <add>, %11, %cst_6 [1] : vector<32x256xf32> to vector<32xf32>
    %13 = vector.shape_cast %12 : vector<32xf32> to vector<32x1xf32>
    %14 = math.log %13 : vector<32x1xf32>
    %15 = vector.broadcast %14 : vector<32x1xf32> to vector<32x256xf32>
    %16 = arith.subf %10, %15 : vector<32x256xf32>
    %c0_7 = arith.constant 0 : index
    %c0_8 = arith.constant 0 : index
    %17 = vector.load %arg4[%c0_7, %c0_8] : memref<32x256xf32, #tpu.memory_space<vmem>>, vector<32x256xf32>
    tpu.vector_store %arg4[%c0_7, %c0_8], %16 {strides = array<i32>} : memref<32x256xf32, #tpu.memory_space<vmem>>, vector<32x256xf32>,
    return
  }
  func.func @transform_0(%arg0: i32) -> (i32, i32) {
    %c0_i32 = arith.constant 0 : i32
    %c0_i32_0 = arith.constant 0 : i32
    return %arg0, %c0_i32 : i32, i32
  }
  func.func @transform_1(%arg0: i32) -> (i32, i32) {
    %c0_i32 = arith.constant 0 : i32
    %c0_i32_0 = arith.constant 0 : i32
    %c0_i32_1 = arith.constant 0 : i32
    return %c0_i32, %c0_i32_0 : i32, i32
  }
  func.func @transform_2(%arg0: i32) -> (i32, i32) {
    %c0_i32 = arith.constant 0 : i32
    %c0_i32_0 = arith.constant 0 : i32
    %c0_i32_1 = arith.constant 0 : i32
    return %c0_i32, %c0_i32_0 : i32, i32
  }
  func.func @transform_3(%arg0: i32) -> (i32, i32) {
    %c0_i32 = arith.constant 0 : i32
    %c0_i32_0 = arith.constant 0 : i32
    return %arg0, %c0_i32 : i32, i32
  }
}

</mosaic_0001>

<bundles_post_ra>
// kernel: decoder_decode.3
= control target key start
LH: loop header
LB: loop body
LE: loop exit
PB: predicated region body
PF: predicated region fallthrough
CT: control target
= control target key end

     0   :  { %8 = vsyncpa [#allocation3], 0  ;;  %s544_s15 = smov [#allocation2]   ;;  %s545_s17 = smov 256   ;;  %s627_s0 = inlined_call_operand.vmem [shape: bf16[32,128], index: 0, kind: input, shape index: {}]   ;;  %s628_s1 = inlined_call_operand.hbm [shape: bf16[128,512], index: 1, kind: input, shape index: {}]   ;;  %s629_s2 = inlined_call_operand.vmem [shape: f32[1,512], index: 2, kind: input, shape index: {}]   ;;  %s630_s3 = inlined_call_operand.vmem [shape: f32[32,512], index: 3, kind: output, shape index: {}]  }
   0x1   :  { %s15_s14 = sshll.u32 %s628_s1, 4  ;;  %s17_s16 = sshll.u32 %s544_s15, 4  ;;  %s16_s14 = int_to_ptr.hbm [resolvable:$true] %s15_s14  ;;  %s18_s16 = int_to_ptr.vmem [resolvable:$true] %s17_s16 }
   0x2   :  { %s546_s18 = smov 16  }
   0x3   :  { %23 = dma.hbm_to_vmem [thread:$0]  %s16_s14, 4096, %s18_s16, [#allocation3], %s545_s17, %s545_s17, %s546_s18  }
   0x4   :  { %542 = dma.done.wait [#allocation3], 4096  }
   0x5   :  { %543 = vsyncadd [#allocation3], 4294963200  ;;  %v467_v0 = vld [vmem:[#allocation2 + $0xe0] sm:$0xf]  ;;  %v513_v1 = vld [vmem:[#allocation2 + $0xec] sm:$0xf0] }
   0x6   :  { %v511_v2 = vld [vmem:[#allocation2 + $0xe4] sm:$0xf]  ;;  %v468_v3 = vor.u32 %v513_v1, %v467_v0  ;;  %v469_v4 = vld [vmem:[#allocation2 + $0xf0] sm:$0xf0]  ;;  %v475_v5 = vld [vmem:[#allocation2 + $0xe8] sm:$0xf] }
   0x7   :  { %v514_v6 = vld [vmem:[#allocation2 + $0xf4] sm:$0xf0]  ;;  %v472_v7 = vor.u32 %v511_v2, %v469_v4  ;;  %v512_v9 = vld [vmem:[#allocation2 + $0xec] sm:$0xf]  ;;  %v477_v10 = vld [vmem:[#allocation2 + $0xf8] sm:$0xf0] }
   0x8   :  { %v476_v8 = vor.u32 %v514_v6, %v475_v5  ;;  %v451_v11 = vld [vmem:[#allocation2 + $0xc0] sm:$0xf]  ;;  %248 = vmatpush.bf16.msra.mxu0 %v468_v3  ;;  %v480_v12 = vor.u32 %v512_v9, %v477_v10  ;;  %v509_v13 = vld [vmem:[#allocation2 + $0xcc] sm:$0xf0]  ;;  %v507_v14 = vld [vmem:[#allocation2 + $0xc4] sm:$0xf] }
   0x9   :  { %v453_v15 = vld [vmem:[#allocation2 + $0xd0] sm:$0xf0]  ;;  %267 = vmatpush.bf16.msra.mxu1 %v472_v7  ;;  %v452_v16 = vor.u32 %v509_v13, %v451_v11  ;;  %v459_v18 = vld [vmem:[#allocation2 + $0xc8] sm:$0xf]  ;;  %v510_v19 = vld [vmem:[#allocation2 + $0xd4] sm:$0xf0] }
   0xa   :  { %286 = vmatpush.bf16.msra.mxu2 %v476_v8  ;;  %v456_v17 = vor.u32 %v507_v14, %v453_v15  ;;  %v508_v20 = vld [vmem:[#allocation2 + $0xcc] sm:$0xf]  ;;  %305 = vmatpush.bf16.msra.mxu3 %v480_v12  ;;  %v460_v21 = vor.u32 %v510_v19, %v459_v18  ;;  %v461_v22 = vld [vmem:[#allocation2 + $0xd8] sm:$0xf0]  ;;  %v435_v23 = vld [vmem:[#allocation2 + $0xa0] sm:$0xf] }
   0xb   :  { %v505_v24 = vld [vmem:[#allocation2 + $0xac] sm:$0xf0]  ;;  %v464_v25 = vor.u32 %v508_v20, %v461_v22  ;;  %v503_v26 = vld [vmem:[#allocation2 + $0xa4] sm:$0xf]  ;;  %v437_v27 = vld [vmem:[#allocation2 + $0xb0] sm:$0xf0] }
   0xc   :  { %v443_v28 = vld [vmem:[#allocation2 + $0xa8] sm:$0xf]  ;;  %249 = vmatpush.bf16.msra.mxu0 %v452_v16  ;;  %v436_v29 = vor.u32 %v505_v24, %v435_v23  ;;  %v506_v30 = vld [vmem:[#allocation2 + $0xb4] sm:$0xf0]  ;;  %v504_v31 = vld [vmem:[#allocation2 + $0xac] sm:$0xf]  ;;  %v440_v33 = vor.u32 %v503_v26, %v437_v27 }
   0xd   :  { %v445_v32 = vld [vmem:[#allocation2 + $0xb8] sm:$0xf0]  ;;  %268 = vmatpush.bf16.msra.mxu1 %v456_v17  ;;  %v444_v34 = vor.u32 %v506_v30, %v443_v28  ;;  %v419_v35 = vld [vmem:[#allocation2 + $0x80] sm:$0xf]  ;;  %v501_v36 = vld [vmem:[#allocation2 + $0x8c] sm:$0xf0] }
   0xe   :  { %287 = vmatpush.bf16.msra.mxu2 %v460_v21  ;;  %v499_v37 = vld [vmem:[#allocation2 + $0x84] sm:$0xf]  ;;  %306 = vmatpush.bf16.msra.mxu3 %v464_v25  ;;  %v448_v38 = vor.u32 %v504_v31, %v445_v32  ;;  %v421_v39 = vld [vmem:[#allocation2 + $0x90] sm:$0xf0]  ;;  %v427_v40 = vld [vmem:[#allocation2 + $0x88] sm:$0xf]  ;;  %v420_v44 = vor.u32 %v501_v36, %v419_v35 }
   0xf   :  { %v502_v41 = vld [vmem:[#allocation2 + $0x94] sm:$0xf0]  ;;  %v500_v42 = vld [vmem:[#allocation2 + $0x8c] sm:$0xf]  ;;  %v429_v43 = vld [vmem:[#allocation2 + $0x98] sm:$0xf0]  ;;  %v424_v45 = vor.u32 %v499_v37, %v421_v39 }
  0x10   :  { %250 = vmatpush.bf16.msra.mxu0 %v436_v29  ;;  %v428_v46 = vor.u32 %v502_v41, %v427_v40  ;;  %v403_v47 = vld [vmem:[#allocation2 + $0x60] sm:$0xf]  ;;  %v497_v48 = vld [vmem:[#allocation2 + $0x6c] sm:$0xf0]  ;;  %v495_v49 = vld [vmem:[#allocation2 + $0x64] sm:$0xf]  ;;  %v432_v50 = vor.u32 %v500_v42, %v429_v43 }
  0x11   :  { %269 = vmatpush.bf16.msra.mxu1 %v440_v33  ;;  %v405_v51 = vld [vmem:[#allocation2 + $0x70] sm:$0xf0]  ;;  %v411_v52 = vld [vmem:[#allocation2 + $0x68] sm:$0xf]  ;;  %v498_v53 = vld [vmem:[#allocation2 + $0x74] sm:$0xf0]  ;;  %v404_v56 = vor.u32 %v497_v48, %v403_v47 }
  0x12   :  { %288 = vmatpush.bf16.msra.mxu2 %v444_v34  ;;  %307 = vmatpush.bf16.msra.mxu3 %v448_v38  ;;  %v496_v54 = vld [vmem:[#allocation2 + $0x6c] sm:$0xf]  ;;  %v413_v55 = vld [vmem:[#allocation2 + $0x78] sm:$0xf0]  ;;  %v408_v57 = vor.u32 %v495_v49, %v405_v51  ;;  %v412_v58 = vor.u32 %v498_v53, %v411_v52  ;;  %v387_v59 = vld [vmem:[#allocation2 + $0x40] sm:$0xf] }
  0x13   :  { %v493_v60 = vld [vmem:[#allocation2 + $0x4c] sm:$0xf0]  ;;  %v491_v61 = vld [vmem:[#allocation2 + $0x44] sm:$0xf]  ;;  %v416_v62 = vor.u32 %v496_v54, %v413_v55  ;;  %v389_v63 = vld [vmem:[#allocation2 + $0x50] sm:$0xf0] }
  0x14   :  { %251 = vmatpush.bf16.msra.mxu0 %v420_v44  ;;  %v395_v0 = vld [vmem:[#allocation2 + $0x48] sm:$0xf]  ;;  %v494_v1 = vld [vmem:[#allocation2 + $0x54] sm:$0xf0]  ;;  %v492_v2 = vld [vmem:[#allocation2 + $0x4c] sm:$0xf]  ;;  %v388_v4 = vor.u32 %v493_v60, %v387_v59  ;;  %v392_v5 = vor.u32 %v491_v61, %v389_v63 }
  0x15   :  { %270 = vmatpush.bf16.msra.mxu1 %v424_v45  ;;  %v397_v3 = vld [vmem:[#allocation2 + $0x58] sm:$0xf0]  ;;  %v396_v6 = vor.u32 %v494_v1, %v395_v0  ;;  %v371_v7 = vld [vmem:[#allocation2 + $0x20] sm:$0xf]  ;;  %v489_v8 = vld [vmem:[#allocation2 + $0x2c] sm:$0xf0] }
  0x16   :  { %289 = vmatpush.bf16.msra.mxu2 %v428_v46  ;;  %308 = vmatpush.bf16.msra.mxu3 %v432_v50  ;;  %v487_v9 = vld [vmem:[#allocation2 + $0x24] sm:$0xf]  ;;  %v400_v10 = vor.u32 %v492_v2, %v397_v3  ;;  %v373_v11 = vld [vmem:[#allocation2 + $0x30] sm:$0xf0]  ;;  %v379_v12 = vld [vmem:[#allocation2 + $0x28] sm:$0xf]  ;;  %v372_v16 = vor.u32 %v489_v8, %v371_v7 }
  0x17   :  { %v490_v13 = vld [vmem:[#allocation2 + $0x34] sm:$0xf0]  ;;  %v488_v14 = vld [vmem:[#allocation2 + $0x2c] sm:$0xf]  ;;  %v381_v15 = vld [vmem:[#allocation2 + $0x38] sm:$0xf0]  ;;  %v376_v17 = vor.u32 %v487_v9, %v373_v11 }
  0x18   :  { %252 = vmatpush.bf16.msra.mxu0 %v404_v56  ;;  %v380_v18 = vor.u32 %v490_v13, %v379_v12  ;;  %v355_v19 = vld [vmem:[#allocation2] sm:$0xf]  ;;  %v485_v20 = vld [vmem:[#allocation2 + $0xc] sm:$0xf0]  ;;  %v483_v21 = vld [vmem:[#allocation2 + $0x4] sm:$0xf]  ;;  %v384_v22 = vor.u32 %v488_v14, %v381_v15 }
  0x19   :  { %271 = vmatpush.bf16.msra.mxu1 %v408_v57  ;;  %v357_v23 = vld [vmem:[#allocation2 + $0x10] sm:$0xf0]  ;;  %v363_v24 = vld [vmem:[#allocation2 + $0x8] sm:$0xf]  ;;  %v486_v25 = vld [vmem:[#allocation2 + $0x14] sm:$0xf0]  ;;  %v356_v28 = vor.u32 %v485_v20, %v355_v19 }
  0x1a   :  { %290 = vmatpush.bf16.msra.mxu2 %v412_v58  ;;  %309 = vmatpush.bf16.msra.mxu3 %v416_v62  ;;  %v484_v26 = vld [vmem:[#allocation2 + $0xc] sm:$0xf]  ;;  %v365_v27 = vld [vmem:[#allocation2 + $0x18] sm:$0xf0]  ;;  %v360_v29 = vor.u32 %v483_v21, %v357_v23  ;;  %v364_v30 = vor.u32 %v486_v25, %v363_v24  ;;  %v481_v32 = vld [vmem:[%s627_s0] sm:$0xff] }
  0x1b   :  { %v368_v31 = vor.u32 %v484_v26, %v365_v27  ;;  %v482_v33 = vld [vmem:[%s627_s0 + $0x8] sm:$0xff]  ;;  %v66_v34 = vld [vmem:[%s629_s2] sm:$0xf] }
  0x1c   :  { %253 = vmatpush.bf16.msra.mxu0 %v388_v4  ;;  %v68_v35 = vperm.slane %v66_v34, 0  ;;  %v69_v36 = vperm.slane %v66_v34, 1  ;;  %v70_v41 = vperm.slane %v66_v34, 2  ;;  %v71_v42 = vperm.slane %v66_v34, 3 }
  0x1d   :  { %272 = vmatpush.bf16.msra.mxu1 %v392_v5 }
  0x1e   :  { %291 = vmatpush.bf16.msra.mxu2 %v396_v6  ;;  %310 = vmatpush.bf16.msra.mxu3 %v400_v10 }
  0x20   :  { %254 = vmatpush.bf16.msra.mxu0 %v372_v16 }
  0x21   :  { %273 = vmatpush.bf16.msra.mxu1 %v376_v17 }
  0x22   :  { %292 = vmatpush.bf16.msra.mxu2 %v380_v18  ;;  %311 = vmatpush.bf16.msra.mxu3 %v384_v22 }
  0x24   :  { %255 = vmatpush.bf16.msra.mxu0 %v356_v28 }
  0x25   :  { %274 = vmatpush.bf16.msra.mxu1 %v360_v29 }
  0x26   :  { %293 = vmatpush.bf16.msra.mxu2 %v364_v30  ;;  %312 = vmatpush.bf16.msra.mxu3 %v368_v31 }
  0x27   :  { %256 = vmatmul.bf16.vlgmr.msra.gmra.mxu0 %v481_v32 }
  0x28   :  { %275 = vmatmul.bf16.vlgmr.msra.gmra.mxu1 %v481_v32 }
  0x29   :  { %294 = vmatmul.bf16.vlgmr.msra.gmra.mxu2 %v481_v32  ;;  %313 = vmatmul.bf16.vlgmr.msra.gmra.mxu3 %v481_v32 }
  0x37   :  { %261 = vmatmul.bf16.gmra.mxu0 %v482_v33 }
  0x38   :  { %280 = vmatmul.bf16.gmra.mxu1 %v482_v33 }
  0x39   :  { %299 = vmatmul.bf16.gmra.mxu2 %v482_v33  ;;  %318 = vmatmul.bf16.gmra.mxu3 %v482_v33 }
  0xa4   :  { %v257_v37 = vpop.f32.mrf.mxu0 }
  0xa5   :  { %v258_v38 = vadd.f32 %v257_v37, %v68_v35  ;;  %v276_v39 = vpop.f32.mrf.mxu1 }
  0xa6   :  { %v277_v40 = vadd.f32 %v276_v39, %v69_v36 }
  0xa7   :  { %324 = vst [vmem:[%s630_s3] sm:$0xff] %v258_v38 }
  0xa8   :  { %325 = vst [vmem:[%s630_s3 + $0x8] sm:$0xff] %v277_v40 }
  0xac   :  { %v295_v43 = vpop.f32.mrf.mxu2  ;;  %v314_v45 = vpop.f32.mrf.mxu3 }
  0xad   :  { %v296_v44 = vadd.f32 %v295_v43, %v70_v41  ;;  %v259_v46 = vpop.f32.mrf.mxu0  ;;  %v315_v47 = vadd.f32 %v314_v45, %v71_v42  ;;  %v278_v49 = vpop.f32.mrf.mxu1 }
  0xae   :  { %v260_v48 = vadd.f32 %v259_v46, %v68_v35  ;;  %v279_v50 = vadd.f32 %v278_v49, %v69_v36 }
  0xaf   :  { %326 = vst [vmem:[%s630_s3 + $0x10] sm:$0xff] %v296_v44 }
  0xb0   :  { %327 = vst [vmem:[%s630_s3 + $0x18] sm:$0xff] %v315_v47 }
  0xb1   :  { %328 = vst [vmem:[%s630_s3 + $0x20] sm:$0xff] %v260_v48 }
  0xb2   :  { %329 = vst [vmem:[%s630_s3 + $0x28] sm:$0xff] %v279_v50 }
  0xb4   :  { %v297_v51 = vpop.f32.mrf.mxu2  ;;  %v316_v53 = vpop.f32.mrf.mxu3 }
  0xb5   :  { %v298_v52 = vadd.f32 %v297_v51, %v70_v41  ;;  %v262_v54 = vpop.f32.mrf.mxu0  ;;  %v317_v55 = vadd.f32 %v316_v53, %v71_v42  ;;  %v281_v57 = vpop.f32.mrf.mxu1 }
  0xb6   :  { %v263_v56 = vadd.f32 %v262_v54, %v68_v35  ;;  %v282_v58 = vadd.f32 %v281_v57, %v69_v36 }
  0xb7   :  { %330 = vst [vmem:[%s630_s3 + $0x30] sm:$0xff] %v298_v52 }
  0xb8   :  { %331 = vst [vmem:[%s630_s3 + $0x38] sm:$0xff] %v317_v55 }
  0xb9   :  { %332 = vst [vmem:[%s630_s3 + $0x40] sm:$0xff] %v263_v56 }
  0xba   :  { %333 = vst [vmem:[%s630_s3 + $0x48] sm:$0xff] %v282_v58 }
  0xbc   :  { %v300_v59 = vpop.f32.mrf.mxu2  ;;  %v319_v61 = vpop.f32.mrf.mxu3 }
  0xbd   :  { %v301_v60 = vadd.f32 %v300_v59, %v70_v41  ;;  %v264_v62 = vpop.f32.mrf.mxu0  ;;  %v320_v63 = vadd.f32 %v319_v61, %v71_v42  ;;  %v283_v1 = vpop.f32.mrf.mxu1 }
  0xbe   :  { %v265_v0 = vadd.f32 %v264_v62, %v68_v35  ;;  %v284_v2 = vadd.f32 %v283_v1, %v69_v36 }
  0xbf   :  { %334 = vst [vmem:[%s630_s3 + $0x50] sm:$0xff] %v301_v60 }
  0xc0   :  { %335 = vst [vmem:[%s630_s3 + $0x58] sm:$0xff] %v320_v63 }
  0xc1   :  { %336 = vst [vmem:[%s630_s3 + $0x60] sm:$0xff] %v265_v0 }
  0xc2   :  { %337 = vst [vmem:[%s630_s3 + $0x68] sm:$0xff] %v284_v2 }
  0xc4   :  { %v302_v3 = vpop.f32.mrf.mxu2  ;;  %v321_v5 = vpop.f32.mrf.mxu3 }
  0xc5   :  { %v303_v4 = vadd.f32 %v302_v3, %v70_v41  ;;  %v322_v6 = vadd.f32 %v321_v5, %v71_v42 }
  0xc7   :  { %338 = vst [vmem:[%s630_s3 + $0x70] sm:$0xff] %v303_v4 }
  0xc8   :  { %339 = vst [vmem:[%s630_s3 + $0x78] sm:$0xff] %v322_v6 }
  0xc9   :  { %344 = vsyncpa [#allocation3], 1 }

// kernel: decoder_decode.5
= control target key start
LH: loop header
LB: loop body
LE: loop exit
PB: predicated region body
PF: predicated region fallthrough
CT: control target
= control target key end

     0   :  { %s537_s0 = inlined_call_operand.vmem [shape: f32[32,128], index: 0, kind: input, shape index: {}]   ;;  %s538_s1 = inlined_call_operand.vmem [shape: bf16[128,256], index: 1, kind: input, shape index: {}]   ;;  %s539_s2 = inlined_call_operand.vmem [shape: f32[1,256], index: 2, kind: input, shape index: {}]   ;;  %s540_s3 = inlined_call_operand.hbm [shape: f32[32,256], index: 3, kind: output, shape index: {}]  }
   0x1   :  { %v309_v0 = vld [vmem:[%s538_s1 + $0x70] sm:$0xf]  ;;  %v330_v1 = vld [vmem:[%s538_s1 + $0x74] sm:$0xf0]  ;;  %v329_v2 = vld [vmem:[%s538_s1 + $0x74] sm:$0xf] }
   0x2   :  { %v310_v3 = vor.u32 %v330_v1, %v309_v0  ;;  %v311_v4 = vld [vmem:[%s538_s1 + $0x78] sm:$0xf0]  ;;  %v301_v5 = vld [vmem:[%s538_s1 + $0x60] sm:$0xf]  ;;  %v328_v6 = vld [vmem:[%s538_s1 + $0x64] sm:$0xf0] }
   0x3   :  { %v314_v7 = vor.u32 %v329_v2, %v311_v4  ;;  %v327_v8 = vld [vmem:[%s538_s1 + $0x64] sm:$0xf]  ;;  %v303_v9 = vld [vmem:[%s538_s1 + $0x68] sm:$0xf0]  ;;  %v302_v10 = vor.u32 %v328_v6, %v301_v5  ;;  %v293_v12 = vld [vmem:[%s538_s1 + $0x50] sm:$0xf] }
   0x4   :  { %123 = vmatpush.bf16.msra.mxu0 %v310_v3  ;;  %331 = vmatpush.bf16.msra.mxu2 %v310_v3  ;;  %v306_v11 = vor.u32 %v327_v8, %v303_v9  ;;  %v326_v13 = vld [vmem:[%s538_s1 + $0x54] sm:$0xf0]  ;;  %v325_v14 = vld [vmem:[%s538_s1 + $0x54] sm:$0xf]  ;;  %v295_v15 = vld [vmem:[%s538_s1 + $0x58] sm:$0xf0] }
   0x5   :  { %142 = vmatpush.bf16.msra.mxu1 %v314_v7  ;;  %339 = vmatpush.bf16.msra.mxu3 %v314_v7  ;;  %v294_v16 = vor.u32 %v326_v13, %v293_v12  ;;  %v298_v17 = vor.u32 %v325_v14, %v295_v15  ;;  %v285_v18 = vld [vmem:[%s538_s1 + $0x40] sm:$0xf]  ;;  %v324_v19 = vld [vmem:[%s538_s1 + $0x44] sm:$0xf0]  ;;  %v323_v20 = vld [vmem:[%s538_s1 + $0x44] sm:$0xf] }
   0x6   :  { %v287_v21 = vld [vmem:[%s538_s1 + $0x48] sm:$0xf0]  ;;  %v286_v22 = vor.u32 %v324_v19, %v285_v18  ;;  %v277_v24 = vld [vmem:[%s538_s1 + $0x30] sm:$0xf]  ;;  %v322_v25 = vld [vmem:[%s538_s1 + $0x34] sm:$0xf0] }
   0x7   :  { %v290_v23 = vor.u32 %v323_v20, %v287_v21 }
   0x8   :  { %124 = vmatpush.bf16.msra.mxu0 %v302_v10  ;;  %332 = vmatpush.bf16.msra.mxu2 %v302_v10 }
   0x9   :  { %143 = vmatpush.bf16.msra.mxu1 %v306_v11  ;;  %340 = vmatpush.bf16.msra.mxu3 %v306_v11 }
   0xc   :  { %125 = vmatpush.bf16.msra.mxu0 %v294_v16  ;;  %333 = vmatpush.bf16.msra.mxu2 %v294_v16 }
   0xd   :  { %144 = vmatpush.bf16.msra.mxu1 %v298_v17  ;;  %341 = vmatpush.bf16.msra.mxu3 %v298_v17 }
   0xe   :  { %8 = vsyncpa [#allocation3], 0  ;;  %v321_v26 = vld [vmem:[%s538_s1 + $0x34] sm:$0xf]  ;;  %v279_v27 = vld [vmem:[%s538_s1 + $0x38] sm:$0xf0]  ;;  %v278_v28 = vor.u32 %v322_v25, %v277_v24 }
   0xf   :  { %v282_v29 = vor.u32 %v321_v26, %v279_v27  ;;  %v269_v30 = vld [vmem:[%s538_s1 + $0x20] sm:$0xf]  ;;  %v320_v31 = vld [vmem:[%s538_s1 + $0x24] sm:$0xf0]  ;;  %v319_v32 = vld [vmem:[%s538_s1 + $0x24] sm:$0xf] }
  0x10   :  { %126 = vmatpush.bf16.msra.mxu0 %v286_v22  ;;  %334 = vmatpush.bf16.msra.mxu2 %v286_v22  ;;  %v271_v33 = vld [vmem:[%s538_s1 + $0x28] sm:$0xf0]  ;;  %v270_v34 = vor.u32 %v320_v31, %v269_v30  ;;  %v261_v36 = vld [vmem:[%s538_s1 + $0x10] sm:$0xf]  ;;  %v318_v37 = vld [vmem:[%s538_s1 + $0x14] sm:$0xf0] }
  0x11   :  { %145 = vmatpush.bf16.msra.mxu1 %v290_v23  ;;  %342 = vmatpush.bf16.msra.mxu3 %v290_v23  ;;  %v274_v35 = vor.u32 %v319_v32, %v271_v33  ;;  %v317_v38 = vld [vmem:[%s538_s1 + $0x14] sm:$0xf]  ;;  %v263_v39 = vld [vmem:[%s538_s1 + $0x18] sm:$0xf0]  ;;  %v262_v40 = vor.u32 %v318_v37, %v261_v36  ;;  %v253_v42 = vld [vmem:[%s538_s1] sm:$0xf] }
  0x12   :  { %v266_v41 = vor.u32 %v317_v38, %v263_v39  ;;  %v316_v43 = vld [vmem:[%s538_s1 + $0x4] sm:$0xf0]  ;;  %v315_v44 = vld [vmem:[%s538_s1 + $0x4] sm:$0xf]  ;;  %v255_v45 = vld [vmem:[%s538_s1 + $0x8] sm:$0xf0] }
  0x13   :  { %v15_v46 = vld [vmem:[%s537_s0] sm:$0xff]  ;;  %v254_v47 = vor.u32 %v316_v43, %v253_v42  ;;  %v16_v48 = vld [vmem:[%s537_s0 + $0x8] sm:$0xff]  ;;  %v17_v49 = vld [vmem:[%s537_s0 + $0x10] sm:$0xff]  ;;  %v258_v51 = vor.u32 %v315_v44, %v255_v45  ;;  %s239_s6 = sshll.u32 %s540_s3, 4  ;;  %s401_s7 = smov 256   ;;  %s240_s6 = int_to_ptr.hbm [resolvable:$true] %s239_s6 }
  0x14   :  { %127 = vmatpush.bf16.msra.mxu0 %v278_v28  ;;  %335 = vmatpush.bf16.msra.mxu2 %v278_v28  ;;  %v18_v50 = vld [vmem:[%s537_s0 + $0x18] sm:$0xff]  ;;  %v19_v52 = vpack.c.bf16 %v16_v48, %v15_v46  ;;  %v37_v54 = vld [vmem:[%s539_s2] sm:$0x3]  ;;  %s400_s0 = smov [#allocation2]   ;;  %s402_s8 = smov 16  }
  0x15   :  { %146 = vmatpush.bf16.msra.mxu1 %v282_v29  ;;  %343 = vmatpush.bf16.msra.mxu3 %v282_v29  ;;  %v20_v53 = vpack.c.bf16 %v18_v50, %v17_v49  ;;  %v39_v55 = vperm.slane %v37_v54, 0  ;;  %v40_v56 = vperm.slane %v37_v54, 1  ;;  %s237_s2 = sshll.u32 %s400_s0, 4  ;;  %s238_s2 = int_to_ptr.vmem [resolvable:$true] %s237_s2 }
  0x18   :  { %128 = vmatpush.bf16.msra.mxu0 %v270_v34  ;;  %336 = vmatpush.bf16.msra.mxu2 %v270_v34 }
  0x19   :  { %147 = vmatpush.bf16.msra.mxu1 %v274_v35  ;;  %344 = vmatpush.bf16.msra.mxu3 %v274_v35 }
  0x1c   :  { %129 = vmatpush.bf16.msra.mxu0 %v262_v40  ;;  %337 = vmatpush.bf16.msra.mxu2 %v262_v40 }
  0x1d   :  { %148 = vmatpush.bf16.msra.mxu1 %v266_v41  ;;  %345 = vmatpush.bf16.msra.mxu3 %v266_v41 }
  0x20   :  { %130 = vmatpush.bf16.msra.mxu0 %v254_v47  ;;  %338 = vmatpush.bf16.msra.mxu2 %v254_v47 }
  0x21   :  { %149 = vmatpush.bf16.msra.mxu1 %v258_v51  ;;  %346 = vmatpush.bf16.msra.mxu3 %v258_v51 }
  0x23   :  { %131 = vmatmul.bf16.vlgmr.msra.gmra.mxu0 %v19_v52  ;;  %136 = vmatmul.bf16.vlgmr.msra.gmra.mxu2 %v20_v53 }
  0x24   :  { %150 = vmatmul.bf16.vlgmr.msra.gmra.mxu1 %v19_v52  ;;  %155 = vmatmul.bf16.vlgmr.msra.gmra.mxu3 %v20_v53 }
  0xa0   :  { %v132_v57 = vpop.f32.mrf.mxu0 }
  0xa1   :  { %v133_v58 = vadd.f32 %v132_v57, %v39_v55  ;;  %v151_v59 = vpop.f32.mrf.mxu1 }
  0xa2   :  { %v152_v60 = vadd.f32 %v151_v59, %v40_v56 }
  0xa4   :  { %v161_v61 = vmax.f32 %v133_v58, %v152_v60 }
  0xa6   :  { %162 = vmax.xlane.f32.xlu0 %v161_v61  ;;  %v137_v62 = vpop.f32.mrf.mxu2 }
  0xa7   :  { %v138_v63 = vadd.f32 %v137_v62, %v39_v55  ;;  %v156_v0 = vpop.f32.mrf.mxu3 }
  0xa8   :  { %v157_v1 = vadd.f32 %v156_v0, %v40_v56  ;;  %v134_v2 = vpop.f32.mrf.mxu0 }
  0xa9   :  { %v135_v3 = vadd.f32 %v134_v2, %v39_v55  ;;  %v153_v4 = vpop.f32.mrf.mxu1 }
  0xaa   :  { %v154_v5 = vadd.f32 %v153_v4, %v40_v56  ;;  %v167_v6 = vmax.f32 %v138_v63, %v157_v1 }
  0xac   :  { %168 = vmax.xlane.f32.xlu1 %v167_v6  ;;  %v164_v7 = vmax.f32 %v135_v3, %v154_v5 }
  0xae   :  { %165 = vmax.xlane.f32.xlu0 %v164_v7  ;;  %v139_v8 = vpop.f32.mrf.mxu2 }
  0xaf   :  { %v140_v9 = vadd.f32 %v139_v8, %v39_v55  ;;  %v158_v10 = vpop.f32.mrf.mxu3 }
  0xb0   :  { %v159_v11 = vadd.f32 %v158_v10, %v40_v56 }
  0xb2   :  { %v170_v12 = vmax.f32 %v140_v9, %v159_v11 }
  0xb4   :  { %171 = vmax.xlane.f32.xlu1 %v170_v12 }
 0x119   :  { %v163_v13 = vpop.xlane.xlu0 %162 }
 0x11a   :  { %v173_v14 = vsub.f32 %v133_v58, %v163_v13  ;;  %v174_v15 = vsub.f32 %v152_v60, %v163_v13 }
 0x11c   :  { %v181_v16 = vmul.f32 1.442695, %v173_v14  ;;  %v183_v17 = vmul.f32 1.442695, %v174_v15 }
 0x11e   :  { %350 = vpow2.f32 %v181_v16 }
 0x11f   :  { %352 = vpow2.f32 %v183_v17  ;;  %v169_v18 = vpop.xlane.xlu1 %168 }
 0x120   :  { %v177_v19 = vsub.f32 %v138_v63, %v169_v18  ;;  %v178_v20 = vsub.f32 %v157_v1, %v169_v18 }
 0x121   :  { %v166_v21 = vpop.xlane.xlu0 %165 }
 0x122   :  { %v189_v22 = vmul.f32 1.442695, %v177_v19  ;;  %v191_v23 = vmul.f32 1.442695, %v178_v20  ;;  %v175_v24 = vsub.f32 %v135_v3, %v166_v21  ;;  %v176_v25 = vsub.f32 %v154_v5, %v166_v21 }
 0x124   :  { %v351_v26 = vpop.eup %350  ;;  %354 = vpow2.f32 %v189_v22  ;;  %v185_v27 = vmul.f32 1.442695, %v175_v24  ;;  %v187_v28 = vmul.f32 1.442695, %v176_v25 }
 0x125   :  { %v353_v29 = vpop.eup %352  ;;  %356 = vpow2.f32 %v191_v23 }
 0x126   :  { %358 = vpow2.f32 %v185_v27  ;;  %v197_v30 = vadd.f32 %v353_v29, %v351_v26 }
 0x127   :  { %360 = vpow2.f32 %v187_v28  ;;  %v172_v31 = vpop.xlane.xlu1 %171 }
 0x128   :  { %v179_v32 = vsub.f32 %v140_v9, %v172_v31  ;;  %v180_v33 = vsub.f32 %v159_v11, %v172_v31  ;;  %198 = vadd.xlane.f32.xlu2 %v197_v30 }
 0x12a   :  { %v355_v34 = vpop.eup %354  ;;  %v193_v35 = vmul.f32 1.442695, %v179_v32  ;;  %v195_v36 = vmul.f32 1.442695, %v180_v33 }
 0x12b   :  { %v357_v37 = vpop.eup %356 }
 0x12c   :  { %v359_v38 = vpop.eup %358  ;;  %362 = vpow2.f32 %v193_v35  ;;  %v203_v39 = vadd.f32 %v357_v37, %v355_v34 }
 0x12d   :  { %v361_v40 = vpop.eup %360  ;;  %364 = vpow2.f32 %v195_v36 }
 0x12e   :  { %204 = vadd.xlane.f32.xlu0 %v203_v39  ;;  %v200_v41 = vadd.f32 %v361_v40, %v359_v38 }
 0x130   :  { %201 = vadd.xlane.f32.xlu2 %v200_v41 }
 0x132   :  { %v363_v42 = vpop.eup %362 }
 0x133   :  { %v365_v43 = vpop.eup %364 }
 0x134   :  { %v206_v44 = vadd.f32 %v365_v43, %v363_v42 }
 0x136   :  { %207 = vadd.xlane.f32.xlu1 %v206_v44 }
 0x19b   :  { %v199_v45 = vpop.xlane.xlu2 %198 }
 0x19c   :  { %366 = vlog2.f32 %v199_v45 }
 0x1a1   :  { %v205_v46 = vpop.xlane.xlu0 %204 }
 0x1a2   :  { %v367_v47 = vpop.eup %366  ;;  %368 = vlog2.f32 %v205_v46 }
 0x1a3   :  { %v210_v48 = vmul.f32 0.6931472, %v367_v47  ;;  %v202_v49 = vpop.xlane.xlu2 %201 }
 0x1a4   :  { %370 = vlog2.f32 %v202_v49 }
 0x1a5   :  { %v217_v50 = vsub.f32 %v173_v14, %v210_v48  ;;  %v218_v51 = vsub.f32 %v174_v15, %v210_v48 }
 0x1a7   :  { %225 = vst [vmem:[#allocation2] sm:$0xff] %v217_v50 }
 0x1a8   :  { %v369_v52 = vpop.eup %368  ;;  %226 = vst [vmem:[#allocation2 + $0x8] sm:$0xff] %v218_v51 }
 0x1a9   :  { %v214_v53 = vmul.f32 0.6931472, %v369_v52  ;;  %v208_v54 = vpop.xlane.xlu1 %207 }
 0x1aa   :  { %v371_v55 = vpop.eup %370  ;;  %372 = vlog2.f32 %v208_v54 }
 0x1ab   :  { %v221_v56 = vsub.f32 %v177_v19, %v214_v53  ;;  %v222_v57 = vsub.f32 %v178_v20, %v214_v53  ;;  %v212_v58 = vmul.f32 0.6931472, %v371_v55 }
 0x1ad   :  { %229 = vst [vmem:[#allocation2 + $0x20] sm:$0xff] %v221_v56  ;;  %v219_v59 = vsub.f32 %v175_v24, %v212_v58  ;;  %v220_v60 = vsub.f32 %v176_v25, %v212_v58 }
 0x1ae   :  { %230 = vst [vmem:[#allocation2 + $0x28] sm:$0xff] %v222_v57 }
 0x1af   :  { %227 = vst [vmem:[#allocation2 + $0x10] sm:$0xff] %v219_v59 }
 0x1b0   :  { %v373_v61 = vpop.eup %372  ;;  %228 = vst [vmem:[#allocation2 + $0x18] sm:$0xff] %v220_v60 }
 0x1b1   :  { %v216_v62 = vmul.f32 0.6931472, %v373_v61 }
 0x1b3   :  { %v223_v63 = vsub.f32 %v179_v32, %v216_v62  ;;  %v224_v0 = vsub.f32 %v180_v33, %v216_v62 }
 0x1b5   :  { %231 = vst [vmem:[#allocation2 + $0x30] sm:$0xff] %v223_v63 }
 0x1b6   :  { %232 = vst [vmem:[#allocation2 + $0x38] sm:$0xff] %v224_v0 }
 0x1b7   :  { %245 = dma.vmem_to_hbm [thread:$0]  %s238_s2, 1024, %s240_s6, [#allocation3], %s401_s7, %s401_s7, %s402_s8  }
 0x1b8   :  { %398 = dma.done.wait [#allocation3], 1024  }
 0x1b9   :  { %399 = vsyncadd [#allocation3], 4294966272 }
 0x1ba   :  { %250 = vsyncpa [#allocation3], 1 }

// kernel: decoder_decode.4
= control target key start
LH: loop header
LB: loop body
LE: loop exit
PB: predicated region body
PF: predicated region fallthrough
CT: control target
= control target key end

     0   :  { %12 = vsyncpa [#allocation5], 0  ;;  %s2319_s0 = inlined_call_operand.vmem [shape: f32[32,512], index: 0, kind: input, shape index: {}]   ;;  %s2320_s1 = inlined_call_operand.hbm [shape: bf16[128,512], index: 1, kind: input, shape index: {}]   ;;  %s2321_s2 = inlined_call_operand.vmem [shape: f32[8,128], index: 2, kind: input, shape index: {}]   ;;  %s2322_s3 = inlined_call_operand.vmem [shape: f32[8,128], index: 3, kind: input, shape index: {}]   ;;  %s2323_s4 = inlined_call_operand.vmem [shape: f32[32,128], index: 4, kind: output, shape index: {0}]   ;;  %s2324_s5 = inlined_call_operand.hbm [shape: f32[8,128], index: 5, kind: output, shape index: {1}]   ;;  %s2325_s6 = inlined_call_operand.hbm [shape: f32[8,128], index: 6, kind: output, shape index: {2}]  }
   0x1   :  { %13 = vsyncpa [#allocation6], 0 }
   0x2   :  { %14 = vsyncpa [#allocation9], 0  ;;  %s21_s23 = sshll.u32 %s2320_s1, 4  ;;  %s2192_s24 = smov [#allocation4]   ;;  %s22_s23 = int_to_ptr.hbm [resolvable:$true] %s21_s23 }
   0x3   :  { %s23_s25 = sshll.u32 %s2192_s24, 4  ;;  %s2193_s26 = smov 256   ;;  %s24_s25 = int_to_ptr.vmem [resolvable:$true] %s23_s25 }
   0x4   :  { %s2194_s27 = smov 16  }
   0x5   :  { %29 = dma.hbm_to_vmem [thread:$0]  %s22_s23, 4096, %s24_s25, [#allocation5], %s2193_s26, %s2193_s26, %s2194_s27  }
   0x6   :  { %2186 = dma.done.wait [#allocation5], 4096  }
   0x7   :  { %2187 = vsyncadd [#allocation5], 4294963200  ;;  %v1492_v0 = vld [vmem:[#allocation4 + $0xe0] sm:$0xf]  ;;  %v1947_v1 = vld [vmem:[#allocation4 + $0xec] sm:$0xf0] }
   0x8   :  { %v1945_v2 = vld [vmem:[#allocation4 + $0xe4] sm:$0xf]  ;;  %v1493_v3 = vor.u32 %v1947_v1, %v1492_v0  ;;  %v1494_v4 = vld [vmem:[#allocation4 + $0xf0] sm:$0xf0]  ;;  %v1946_v5 = vld [vmem:[#allocation4 + $0xec] sm:$0xf] }
   0x9   :  { %v1502_v6 = vld [vmem:[#allocation4 + $0xf8] sm:$0xf0]  ;;  %v1497_v7 = vor.u32 %v1945_v2, %v1494_v4  ;;  %v1476_v9 = vld [vmem:[#allocation4 + $0xc0] sm:$0xf]  ;;  %v1943_v10 = vld [vmem:[#allocation4 + $0xcc] sm:$0xf0] }
   0xa   :  { %v1505_v8 = vor.u32 %v1946_v5, %v1502_v6  ;;  %v1941_v11 = vld [vmem:[#allocation4 + $0xc4] sm:$0xf]  ;;  %248 = vmatpush.bf16.msra.mxu0 %v1493_v3  ;;  %v1477_v12 = vor.u32 %v1943_v10, %v1476_v9  ;;  %v1478_v13 = vld [vmem:[#allocation4 + $0xd0] sm:$0xf0]  ;;  %v1942_v14 = vld [vmem:[#allocation4 + $0xcc] sm:$0xf] }
   0xb   :  { %v1486_v15 = vld [vmem:[#allocation4 + $0xd8] sm:$0xf0]  ;;  %261 = vmatpush.bf16.msra.mxu1 %v1497_v7  ;;  %v1481_v16 = vor.u32 %v1941_v11, %v1478_v13  ;;  %v1500_v18 = vld [vmem:[#allocation4 + $0xe8] sm:$0xf]  ;;  %v1948_v19 = vld [vmem:[#allocation4 + $0xf4] sm:$0xf0] }
   0xc   :  { %287 = vmatpush.bf16.msra.mxu3 %v1505_v8  ;;  %v1489_v17 = vor.u32 %v1942_v14, %v1486_v15  ;;  %v1460_v20 = vld [vmem:[#allocation4 + $0xa0] sm:$0xf]  ;;  %v1501_v21 = vor.u32 %v1948_v19, %v1500_v18  ;;  %v1939_v22 = vld [vmem:[#allocation4 + $0xac] sm:$0xf0]  ;;  %v1937_v23 = vld [vmem:[#allocation4 + $0xa4] sm:$0xf] }
   0xd   :  { %v1462_v24 = vld [vmem:[#allocation4 + $0xb0] sm:$0xf0]  ;;  %v1938_v25 = vld [vmem:[#allocation4 + $0xac] sm:$0xf]  ;;  %v1470_v26 = vld [vmem:[#allocation4 + $0xb8] sm:$0xf0]  ;;  %v1461_v28 = vor.u32 %v1939_v22, %v1460_v20 }
   0xe   :  { %v1484_v27 = vld [vmem:[#allocation4 + $0xc8] sm:$0xf]  ;;  %249 = vmatpush.bf16.msra.mxu0 %v1477_v12  ;;  %274 = vmatpush.bf16.msra.mxu2 %v1501_v21  ;;  %v1944_v29 = vld [vmem:[#allocation4 + $0xd4] sm:$0xf0]  ;;  %v1444_v30 = vld [vmem:[#allocation4 + $0x80] sm:$0xf]  ;;  %v1465_v32 = vor.u32 %v1937_v23, %v1462_v24  ;;  %v1473_v33 = vor.u32 %v1938_v25, %v1470_v26 }
   0xf   :  { %v1935_v31 = vld [vmem:[#allocation4 + $0x8c] sm:$0xf0]  ;;  %262 = vmatpush.bf16.msra.mxu1 %v1481_v16  ;;  %v1485_v34 = vor.u32 %v1944_v29, %v1484_v27  ;;  %v1933_v35 = vld [vmem:[#allocation4 + $0x84] sm:$0xf]  ;;  %v1446_v36 = vld [vmem:[#allocation4 + $0x90] sm:$0xf0] }
  0x10   :  { %288 = vmatpush.bf16.msra.mxu3 %v1489_v17  ;;  %v1934_v37 = vld [vmem:[#allocation4 + $0x8c] sm:$0xf]  ;;  %v1454_v38 = vld [vmem:[#allocation4 + $0x98] sm:$0xf0]  ;;  %v1468_v39 = vld [vmem:[#allocation4 + $0xa8] sm:$0xf]  ;;  %v1445_v41 = vor.u32 %v1935_v31, %v1444_v30  ;;  %v1449_v45 = vor.u32 %v1933_v35, %v1446_v36 }
  0x11   :  { %v1940_v40 = vld [vmem:[#allocation4 + $0xb4] sm:$0xf0]  ;;  %v1428_v43 = vld [vmem:[#allocation4 + $0x60] sm:$0xf]  ;;  %v1931_v44 = vld [vmem:[#allocation4 + $0x6c] sm:$0xf0]  ;;  %v1457_v46 = vor.u32 %v1934_v37, %v1454_v38 }
  0x12   :  { %250 = vmatpush.bf16.msra.mxu0 %v1461_v28  ;;  %275 = vmatpush.bf16.msra.mxu2 %v1485_v34  ;;  %v1469_v42 = vor.u32 %v1940_v40, %v1468_v39  ;;  %v1929_v47 = vld [vmem:[#allocation4 + $0x64] sm:$0xf]  ;;  %v1452_v48 = vld [vmem:[#allocation4 + $0x88] sm:$0xf]  ;;  %v1936_v49 = vld [vmem:[#allocation4 + $0x94] sm:$0xf0]  ;;  %v1429_v53 = vor.u32 %v1931_v44, %v1428_v43 }
  0x13   :  { %263 = vmatpush.bf16.msra.mxu1 %v1465_v32  ;;  %v1430_v50 = vld [vmem:[#allocation4 + $0x70] sm:$0xf0]  ;;  %v1930_v51 = vld [vmem:[#allocation4 + $0x6c] sm:$0xf]  ;;  %v1438_v52 = vld [vmem:[#allocation4 + $0x78] sm:$0xf0]  ;;  %v1453_v54 = vor.u32 %v1936_v49, %v1452_v48 }
  0x14   :  { %289 = vmatpush.bf16.msra.mxu3 %v1473_v33  ;;  %v1412_v55 = vld [vmem:[#allocation4 + $0x40] sm:$0xf]  ;;  %v1927_v56 = vld [vmem:[#allocation4 + $0x4c] sm:$0xf0]  ;;  %v1433_v57 = vor.u32 %v1929_v47, %v1430_v50  ;;  %v1441_v58 = vor.u32 %v1930_v51, %v1438_v52  ;;  %v1925_v59 = vld [vmem:[#allocation4 + $0x44] sm:$0xf] }
  0x15   :  { %v1436_v60 = vld [vmem:[#allocation4 + $0x68] sm:$0xf]  ;;  %v1932_v61 = vld [vmem:[#allocation4 + $0x74] sm:$0xf0]  ;;  %v1414_v62 = vld [vmem:[#allocation4 + $0x50] sm:$0xf0]  ;;  %v1413_v1 = vor.u32 %v1927_v56, %v1412_v55 }
  0x16   :  { %251 = vmatpush.bf16.msra.mxu0 %v1445_v41  ;;  %276 = vmatpush.bf16.msra.mxu2 %v1469_v42  ;;  %v1926_v63 = vld [vmem:[#allocation4 + $0x4c] sm:$0xf]  ;;  %v1422_v0 = vld [vmem:[#allocation4 + $0x58] sm:$0xf0]  ;;  %v1437_v2 = vor.u32 %v1932_v61, %v1436_v60  ;;  %v1396_v3 = vld [vmem:[#allocation4 + $0x20] sm:$0xf]  ;;  %v1417_v5 = vor.u32 %v1925_v59, %v1414_v62 }
  0x17   :  { %264 = vmatpush.bf16.msra.mxu1 %v1449_v45  ;;  %v1923_v4 = vld [vmem:[#allocation4 + $0x2c] sm:$0xf0]  ;;  %v1425_v6 = vor.u32 %v1926_v63, %v1422_v0  ;;  %v1921_v7 = vld [vmem:[#allocation4 + $0x24] sm:$0xf]  ;;  %v1420_v8 = vld [vmem:[#allocation4 + $0x48] sm:$0xf] }
  0x18   :  { %290 = vmatpush.bf16.msra.mxu3 %v1457_v46  ;;  %v1928_v9 = vld [vmem:[#allocation4 + $0x54] sm:$0xf0]  ;;  %v1398_v10 = vld [vmem:[#allocation4 + $0x30] sm:$0xf0]  ;;  %v1922_v11 = vld [vmem:[#allocation4 + $0x2c] sm:$0xf]  ;;  %v1397_v13 = vor.u32 %v1923_v4, %v1396_v3 }
  0x19   :  { %v1406_v12 = vld [vmem:[#allocation4 + $0x38] sm:$0xf0]  ;;  %v1421_v14 = vor.u32 %v1928_v9, %v1420_v8  ;;  %v1380_v15 = vld [vmem:[#allocation4] sm:$0xf]  ;;  %v1919_v16 = vld [vmem:[#allocation4 + $0xc] sm:$0xf0]  ;;  %v1401_v17 = vor.u32 %v1921_v7, %v1398_v10 }
  0x1a   :  { %252 = vmatpush.bf16.msra.mxu0 %v1429_v53  ;;  %277 = vmatpush.bf16.msra.mxu2 %v1453_v54  ;;  %v1409_v18 = vor.u32 %v1922_v11, %v1406_v12  ;;  %v1917_v19 = vld [vmem:[#allocation4 + $0x4] sm:$0xf]  ;;  %v1404_v20 = vld [vmem:[#allocation4 + $0x28] sm:$0xf]  ;;  %v1924_v21 = vld [vmem:[#allocation4 + $0x34] sm:$0xf0]  ;;  %v1381_v25 = vor.u32 %v1919_v16, %v1380_v15 }
  0x1b   :  { %265 = vmatpush.bf16.msra.mxu1 %v1433_v57  ;;  %v1382_v22 = vld [vmem:[#allocation4 + $0x10] sm:$0xf0]  ;;  %v1918_v23 = vld [vmem:[#allocation4 + $0xc] sm:$0xf]  ;;  %v1390_v24 = vld [vmem:[#allocation4 + $0x18] sm:$0xf0]  ;;  %v1405_v27 = vor.u32 %v1924_v21, %v1404_v20 }
  0x1c   :  { %291 = vmatpush.bf16.msra.mxu3 %v1441_v58  ;;  %v42_v26 = vld [vmem:[%s2321_s2] sm:$0xff]  ;;  %v1385_v28 = vor.u32 %v1917_v19, %v1382_v22  ;;  %v1393_v29 = vor.u32 %v1918_v23, %v1390_v24  ;;  %v1388_v30 = vld [vmem:[#allocation4 + $0x8] sm:$0xf]  ;;  %v1920_v31 = vld [vmem:[#allocation4 + $0x14] sm:$0xf0]  ;;  %s1358_s19 = sshll.u32 %s2325_s6, 4  ;;  %s1359_s19 = int_to_ptr.hbm [resolvable:$true] %s1358_s19 }
  0x1d   :  { %v55_v32 = vpack.c.bf16 %v42_v26, %v42_v26  ;;  %v1389_v33 = vor.u32 %v1920_v31, %v1388_v30  ;;  %v1627_v34 = vld [vmem:[#allocation4 + $0xe0] sm:$0xf]  ;;  %v1979_v35 = vld [vmem:[#allocation4 + $0xec] sm:$0xf0]  ;;  %v1977_v36 = vld [vmem:[#allocation4 + $0xe4] sm:$0xf] }
  0x1e   :  { %253 = vmatpush.bf16.msra.mxu0 %v1413_v1  ;;  %278 = vmatpush.bf16.msra.mxu2 %v1437_v2  ;;  %v1628_v37 = vor.u32 %v1979_v35, %v1627_v34  ;;  %v1629_v38 = vld [vmem:[#allocation4 + $0xf0] sm:$0xf0]  ;;  %v1635_v39 = vld [vmem:[#allocation4 + $0xe8] sm:$0xf]  ;;  %v1980_v40 = vld [vmem:[#allocation4 + $0xf4] sm:$0xf0] }
  0x1f   :  { %266 = vmatpush.bf16.msra.mxu1 %v1417_v5  ;;  %v1632_v41 = vor.u32 %v1977_v36, %v1629_v38  ;;  %v1636_v42 = vor.u32 %v1980_v40, %v1635_v39  ;;  %v1978_v43 = vld [vmem:[#allocation4 + $0xec] sm:$0xf]  ;;  %v1637_v44 = vld [vmem:[#allocation4 + $0xf8] sm:$0xf0]  ;;  %v1611_v46 = vld [vmem:[#allocation4 + $0xc0] sm:$0xf] }
  0x20   :  { %292 = vmatpush.bf16.msra.mxu3 %v1425_v6  ;;  %v1640_v45 = vor.u32 %v1978_v43, %v1637_v44  ;;  %v1975_v47 = vld [vmem:[#allocation4 + $0xcc] sm:$0xf0]  ;;  %v1973_v48 = vld [vmem:[#allocation4 + $0xc4] sm:$0xf]  ;;  %v1613_v50 = vld [vmem:[#allocation4 + $0xd0] sm:$0xf0] }
  0x21   :  { %v1612_v49 = vor.u32 %v1975_v47, %v1611_v46  ;;  %v1619_v51 = vld [vmem:[#allocation4 + $0xc8] sm:$0xf]  ;;  %v1976_v52 = vld [vmem:[#allocation4 + $0xd4] sm:$0xf0]  ;;  %v1616_v53 = vor.u32 %v1973_v48, %v1613_v50  ;;  %v1974_v55 = vld [vmem:[#allocation4 + $0xcc] sm:$0xf] }
  0x22   :  { %254 = vmatpush.bf16.msra.mxu0 %v1397_v13  ;;  %279 = vmatpush.bf16.msra.mxu2 %v1421_v14  ;;  %v1620_v54 = vor.u32 %v1976_v52, %v1619_v51  ;;  %v1621_v56 = vld [vmem:[#allocation4 + $0xd8] sm:$0xf0]  ;;  %v1595_v58 = vld [vmem:[#allocation4 + $0xa0] sm:$0xf]  ;;  %v1971_v59 = vld [vmem:[#allocation4 + $0xac] sm:$0xf0] }
  0x23   :  { %267 = vmatpush.bf16.msra.mxu1 %v1401_v17  ;;  %v1624_v57 = vor.u32 %v1974_v55, %v1621_v56  ;;  %v1969_v60 = vld [vmem:[#allocation4 + $0xa4] sm:$0xf]  ;;  %v1596_v61 = vor.u32 %v1971_v59, %v1595_v58  ;;  %v1597_v62 = vld [vmem:[#allocation4 + $0xb0] sm:$0xf0]  ;;  %v1603_v63 = vld [vmem:[#allocation4 + $0xa8] sm:$0xf] }
  0x24   :  { %293 = vmatpush.bf16.msra.mxu3 %v1409_v18  ;;  %v1600_v0 = vor.u32 %v1969_v60, %v1597_v62  ;;  %v1972_v1 = vld [vmem:[#allocation4 + $0xb4] sm:$0xf0]  ;;  %v1970_v2 = vld [vmem:[#allocation4 + $0xac] sm:$0xf]  ;;  %v1605_v3 = vld [vmem:[#allocation4 + $0xb8] sm:$0xf0] }
  0x25   :  { %v1604_v4 = vor.u32 %v1972_v1, %v1603_v63  ;;  %v1608_v5 = vor.u32 %v1970_v2, %v1605_v3  ;;  %v1579_v6 = vld [vmem:[#allocation4 + $0x80] sm:$0xf]  ;;  %v1967_v7 = vld [vmem:[#allocation4 + $0x8c] sm:$0xf0]  ;;  %v1965_v8 = vld [vmem:[#allocation4 + $0x84] sm:$0xf] }
  0x26   :  { %255 = vmatpush.bf16.msra.mxu0 %v1381_v25  ;;  %280 = vmatpush.bf16.msra.mxu2 %v1405_v27  ;;  %v1580_v9 = vor.u32 %v1967_v7, %v1579_v6  ;;  %v1581_v10 = vld [vmem:[#allocation4 + $0x90] sm:$0xf0]  ;;  %v1587_v11 = vld [vmem:[#allocation4 + $0x88] sm:$0xf]  ;;  %v1968_v12 = vld [vmem:[#allocation4 + $0x94] sm:$0xf0] }
  0x27   :  { %268 = vmatpush.bf16.msra.mxu1 %v1385_v28  ;;  %v1584_v13 = vor.u32 %v1965_v8, %v1581_v10  ;;  %v1588_v14 = vor.u32 %v1968_v12, %v1587_v11  ;;  %v1966_v15 = vld [vmem:[#allocation4 + $0x8c] sm:$0xf]  ;;  %v1589_v16 = vld [vmem:[#allocation4 + $0x98] sm:$0xf0]  ;;  %v51_v17 = vld [vmem:[%s2319_s0] sm:$0xff]  ;;  %s2196_s20 = smov [#allocation7]  }
  0x28   :  { %294 = vmatpush.bf16.msra.mxu3 %v1393_v29  ;;  %v1592_v18 = vor.u32 %v1966_v15, %v1589_v16  ;;  %v1563_v19 = vld [vmem:[#allocation4 + $0x60] sm:$0xf]  ;;  %v1963_v20 = vld [vmem:[#allocation4 + $0x6c] sm:$0xf0]  ;;  %v1961_v21 = vld [vmem:[#allocation4 + $0x64] sm:$0xf] }
  0x29   :  { %256 = vmatmul.bf16.vlgmr.msra.gmra.mxu0 %v55_v32  ;;  %v1564_v22 = vor.u32 %v1963_v20, %v1563_v19  ;;  %v1565_v23 = vld [vmem:[#allocation4 + $0x70] sm:$0xf0]  ;;  %v1571_v24 = vld [vmem:[#allocation4 + $0x68] sm:$0xf]  ;;  %v1964_v25 = vld [vmem:[#allocation4 + $0x74] sm:$0xf0] }
  0x2a   :  { %269 = vmatmul.bf16.vlgmr.msra.gmra.mxu1 %v55_v32  ;;  %281 = vmatpush.bf16.msra.mxu2 %v1389_v33  ;;  %v52_v26 = vld [vmem:[%s2319_s0 + $0x8] sm:$0xff]  ;;  %v1568_v27 = vor.u32 %v1961_v21, %v1565_v23  ;;  %v1572_v28 = vor.u32 %v1964_v25, %v1571_v24  ;;  %v1573_v30 = vld [vmem:[#allocation4 + $0x78] sm:$0xf0]  ;;  %v1547_v35 = vld [vmem:[#allocation4 + $0x40] sm:$0xf]  ;;  %s1345_s6 = sshll.u32 %s2196_s20, 4  ;;  %s1346_s6 = int_to_ptr.vmem [resolvable:$true] %s1345_s6 }
  0x2b   :  { %295 = vmatmul.bf16.vlgmr.msra.gmra.mxu3 %v55_v32  ;;  %568 = vmatpush.bf16.msrb.mxu0 %v1628_v37  ;;  %v1962_v29 = vld [vmem:[#allocation4 + $0x6c] sm:$0xf]  ;;  %v1959_v36 = vld [vmem:[#allocation4 + $0x4c] sm:$0xf0]  ;;  %v1957_v37 = vld [vmem:[#allocation4 + $0x44] sm:$0xf] }
  0x2c   :  { %581 = vmatpush.bf16.msrb.mxu1 %v1632_v41  ;;  %607 = vmatpush.bf16.msrb.mxu3 %v1640_v45  ;;  %v1548_v39 = vor.u32 %v1959_v36, %v1547_v35  ;;  %v1549_v40 = vld [vmem:[#allocation4 + $0x50] sm:$0xf0]  ;;  %v1555_v41 = vld [vmem:[#allocation4 + $0x48] sm:$0xf]  ;;  %v54_v44 = vld [vmem:[%s2319_s0 + $0x18] sm:$0xff]  ;;  %s1347_s23 = sshll.u32 %s2324_s5, 4  ;;  %s1348_s23 = int_to_ptr.hbm [resolvable:$true] %s1347_s23 }
  0x2d   :  { %282 = vmatmul.bf16.vlgmr.msra.gmra.mxu2 %v55_v32  ;;  %v1576_v32 = vor.u32 %v1962_v29, %v1573_v30  ;;  %v1552_v45 = vor.u32 %v1957_v37, %v1549_v40  ;;  %v1958_v47 = vld [vmem:[#allocation4 + $0x4c] sm:$0xf]  ;;  %v1557_v48 = vld [vmem:[#allocation4 + $0x58] sm:$0xf0]  ;;  %v1531_v51 = vld [vmem:[#allocation4 + $0x20] sm:$0xf] }
  0x2e   :  { %594 = vmatpush.bf16.msrb.mxu2 %v1636_v42  ;;  %v1960_v42 = vld [vmem:[#allocation4 + $0x54] sm:$0xf0]  ;;  %v1560_v50 = vor.u32 %v1958_v47, %v1557_v48  ;;  %v1955_v52 = vld [vmem:[#allocation4 + $0x2c] sm:$0xf0]  ;;  %v1533_v55 = vld [vmem:[#allocation4 + $0x30] sm:$0xf0] }
  0x2f   :  { %569 = vmatpush.bf16.msrb.mxu0 %v1612_v49  ;;  %v1556_v46 = vor.u32 %v1960_v42, %v1555_v41  ;;  %v1539_v56 = vld [vmem:[#allocation4 + $0x28] sm:$0xf]  ;;  %v1956_v58 = vld [vmem:[#allocation4 + $0x34] sm:$0xf0]  ;;  %v1954_v59 = vld [vmem:[#allocation4 + $0x2c] sm:$0xf] }
  0x30   :  { %582 = vmatpush.bf16.msrb.mxu1 %v1616_v53  ;;  %608 = vmatpush.bf16.msrb.mxu3 %v1624_v57  ;;  %v1532_v53 = vor.u32 %v1955_v52, %v1531_v51  ;;  %v1541_v60 = vld [vmem:[#allocation4 + $0x38] sm:$0xf0]  ;;  %v1540_v62 = vor.u32 %v1956_v58, %v1539_v56  ;;  %v1951_v1 = vld [vmem:[#allocation4 + $0xc] sm:$0xf0]  ;;  %v1949_v2 = vld [vmem:[#allocation4 + $0x4] sm:$0xf] }
  0x31   :  { %v1544_v63 = vor.u32 %v1954_v59, %v1541_v60  ;;  %v1517_v6 = vld [vmem:[#allocation4 + $0x10] sm:$0xf0]  ;;  %v1523_v7 = vld [vmem:[#allocation4 + $0x8] sm:$0xf]  ;;  %v1952_v8 = vld [vmem:[#allocation4 + $0x14] sm:$0xf0] }
  0x32   :  { %595 = vmatpush.bf16.msrb.mxu2 %v1620_v54  ;;  %v1953_v54 = vld [vmem:[#allocation4 + $0x24] sm:$0xf]  ;;  %v1520_v10 = vor.u32 %v1949_v2, %v1517_v6  ;;  %v1950_v11 = vld [vmem:[#allocation4 + $0xc] sm:$0xf]  ;;  %v1525_v12 = vld [vmem:[#allocation4 + $0x18] sm:$0xf0] }
  0x33   :  { %570 = vmatpush.bf16.msrb.mxu0 %v1596_v61  ;;  %v1536_v57 = vor.u32 %v1953_v54, %v1533_v55  ;;  %v1528_v15 = vor.u32 %v1950_v11, %v1525_v12  ;;  %v53_v21 = vld [vmem:[%s2319_s0 + $0x10] sm:$0xff]  ;;  %v1771_v6 = vld [vmem:[#allocation4 + $0xe8] sm:$0xf]  ;;  %v1773_v11 = vld [vmem:[#allocation4 + $0xf8] sm:$0xf0] }
  0x34   :  { %583 = vmatpush.bf16.msrb.mxu1 %v1600_v0  ;;  %609 = vmatpush.bf16.msrb.mxu3 %v1608_v5  ;;  %v1515_v0 = vld [vmem:[#allocation4] sm:$0xf]  ;;  %v2011_v2 = vld [vmem:[#allocation4 + $0xec] sm:$0xf0] }
  0x35   :  { %v1516_v5 = vor.u32 %v1951_v1, %v1515_v0  ;;  %v1763_v1 = vld [vmem:[#allocation4 + $0xe0] sm:$0xf] }
  0x36   :  { %596 = vmatpush.bf16.msrb.mxu2 %v1604_v4 }
  0x37   :  { %571 = vmatpush.bf16.msrb.mxu0 %v1580_v9 }
  0x38   :  { %584 = vmatpush.bf16.msrb.mxu1 %v1584_v13  ;;  %610 = vmatpush.bf16.msrb.mxu3 %v1592_v18 }
  0x3a   :  { %597 = vmatpush.bf16.msrb.mxu2 %v1588_v14  ;;  %v1524_v14 = vor.u32 %v1952_v8, %v1523_v7  ;;  %v2012_v7 = vld [vmem:[#allocation4 + $0xf4] sm:$0xf0] }
  0x3b   :  { %572 = vmatpush.bf16.msrb.mxu0 %v1564_v22 }
  0x3c   :  { %585 = vmatpush.bf16.msrb.mxu1 %v1568_v27  ;;  %611 = vmatpush.bf16.msrb.mxu3 %v1576_v32 }
  0x3e   :  { %598 = vmatpush.bf16.msrb.mxu2 %v1572_v28 }
  0x3f   :  { %573 = vmatpush.bf16.msrb.mxu0 %v1548_v39 }
  0x40   :  { %586 = vmatpush.bf16.msrb.mxu1 %v1552_v45  ;;  %612 = vmatpush.bf16.msrb.mxu3 %v1560_v50 }
  0x42   :  { %599 = vmatpush.bf16.msrb.mxu2 %v1556_v46  ;;  %v44_v46 = vld [vmem:[%s2322_s3] sm:$0xff] }
  0x43   :  { %574 = vmatpush.bf16.msrb.mxu0 %v1532_v53 }
  0x44   :  { %587 = vmatpush.bf16.msrb.mxu1 %v1536_v57  ;;  %613 = vmatpush.bf16.msrb.mxu3 %v1544_v63 }
  0x46   :  { %600 = vmatpush.bf16.msrb.mxu2 %v1540_v62 }
  0x47   :  { %575 = vmatpush.bf16.msrb.mxu0 %v1516_v5  ;;  %v1765_v5 = vld [vmem:[#allocation4 + $0xf0] sm:$0xf0] }
  0x48   :  { %588 = vmatpush.bf16.msrb.mxu1 %v1520_v10  ;;  %614 = vmatpush.bf16.msrb.mxu3 %v1528_v15  ;;  %v2010_v10 = vld [vmem:[#allocation4 + $0xec] sm:$0xf]  ;;  %v2005_v15 = vld [vmem:[#allocation4 + $0xc4] sm:$0xf] }
  0x49   :  { %v1776_v12 = vor.u32 %v2010_v10, %v1773_v11  ;;  %v1992_v10 = vld [vmem:[#allocation4 + $0x54] sm:$0xf0] }
  0x4a   :  { %601 = vmatpush.bf16.msrb.mxu2 %v1524_v14  ;;  %v2007_v14 = vld [vmem:[#allocation4 + $0xcc] sm:$0xf0] }
  0x4c   :  { %928 = vmatpush.bf16.msra.mxu3 %v1776_v12 }
  0xa6   :  { %v257_v31 = vpop.f32.mrf.mxu0 }
  0xa7   :  { %v300_v33 = vadd.f32 %v257_v31, %v51_v17  ;;  %v270_v34 = vpop.f32.mrf.mxu1 }
  0xa8   :  { %v301_v38 = vadd.f32 %v270_v34, %v52_v26 }
  0xa9   :  { %v1506_v43 = vmul.f32 -1.442695, %v300_v33 }
  0xaa   :  { %v1507_v49 = vmul.f32 -1.442695, %v301_v38 }
  0xab   :  { %2050 = vpow2.f32 %v1506_v43 }
  0xac   :  { %2052 = vpow2.f32 %v1507_v49 }
  0xae   :  { %v296_v61 = vpop.f32.mrf.mxu3  ;;  %v259_v4 = vpop.f32.mrf.mxu0 }
  0xaf   :  { %v303_v3 = vadd.f32 %v296_v61, %v54_v44  ;;  %v272_v9 = vpop.f32.mrf.mxu1  ;;  %v1764_v4 = vor.u32 %v2011_v2, %v1763_v1 }
  0xb0   :  { %v283_v17 = vpop.f32.mrf.mxu2  ;;  %v1772_v9 = vor.u32 %v2012_v7, %v1771_v6  ;;  %v1989_v6 = vld [vmem:[#allocation4 + $0x44] sm:$0xf] }
  0xb1   :  { %v1508_v13 = vmul.f32 -1.442695, %v303_v3  ;;  %v2051_v16 = vpop.eup %2050  ;;  %v302_v24 = vadd.f32 %v283_v17, %v53_v21  ;;  %v2009_v3 = vld [vmem:[#allocation4 + $0xe4] sm:$0xf]  ;;  %889 = vmatpush.bf16.msra.mxu0 %v1764_v4  ;;  %v1749_v17 = vld [vmem:[#allocation4 + $0xd0] sm:$0xf0] }
  0xb2   :  { %v2053_v18 = vpop.eup %2052  ;;  %v307_v19 = vadd.f32 1.0, %v2051_v16  ;;  %v1768_v8 = vor.u32 %v2009_v3, %v1765_v5  ;;  %915 = vmatpush.bf16.msra.mxu2 %v1772_v9  ;;  %v1683_v4 = vld [vmem:[#allocation4 + $0x40] sm:$0xf]  ;;  %v1991_v5 = vld [vmem:[#allocation4 + $0x4c] sm:$0xf0] }
  0xb3   :  { %2054 = vpow2.f32 %v1508_v13  ;;  %v326_v20 = vadd.f32 1.0, %v2053_v18  ;;  %v1747_v13 = vld [vmem:[#allocation4 + $0xc0] sm:$0xf]  ;;  %v1755_v18 = vld [vmem:[#allocation4 + $0xc8] sm:$0xf]  ;;  %v1684_v7 = vor.u32 %v1991_v5, %v1683_v4 }
  0xb4   :  { %2056 = vrcp.f32 %v307_v19  ;;  %v319_v33 = vand.u32 2147483648, %v307_v19  ;;  %v317_v36 = vand.u32 2147483647, %v307_v19  ;;  %vm313_vm2 = vweird.f32 %v307_v19  ;;  %902 = vmatpush.bf16.msra.mxu1 %v1768_v8  ;;  %v1685_v8 = vld [vmem:[#allocation4 + $0x50] sm:$0xf0] }
  0xb5   :  { %2058 = vrcp.f32 %v326_v20  ;;  %v338_v34 = vand.u32 2147483648, %v326_v20  ;;  %v336_v38 = vand.u32 2147483647, %v326_v20  ;;  %vm332_vm3 = vweird.f32 %v326_v20  ;;  %v1691_v9 = vld [vmem:[#allocation4 + $0x48] sm:$0xf] }
  0xb6   :  { %v298_v22 = vpop.f32.mrf.mxu3  ;;  %v320_v43 = vor.u32 1.1754944e-38, %v319_v33  ;;  %vm318_vm6 = vcmp.eq.f32.partialorder %v317_v36, 8.507059e+37  ;;  %v1748_v16 = vor.u32 %v2007_v14, %v1747_v13  ;;  %v1512_v13 = vld [vmem:[%s2319_s0 + $0x38] sm:$0xff]  ;;  %v1688_v14 = vor.u32 %v1989_v6, %v1685_v8 }
  0xb7   :  { %v339_v45 = vor.u32 1.1754944e-38, %v338_v34  ;;  %vm337_vm7 = vcmp.eq.f32.partialorder %v336_v38, 8.507059e+37  ;;  %v2006_v22 = vld [vmem:[#allocation4 + $0xcc] sm:$0xf]  ;;  %v1999_v38 = vld [vmem:[#allocation4 + $0x8c] sm:$0xf0] }
  0xb8   :  { %v285_v26 = vpop.f32.mrf.mxu2  ;;  %890 = vmatpush.bf16.msra.mxu0 %v1748_v16  ;;  %v2002_v34 = vld [vmem:[#allocation4 + $0xac] sm:$0xf] }
  0xb9   :  { %v2055_v23 = vpop.eup %2054  ;;  %v2003_v26 = vld [vmem:[#allocation4 + $0xac] sm:$0xf0]  ;;  %v1990_v16 = vld [vmem:[#allocation4 + $0x4c] sm:$0xf] }
  0xba   :  { %v346_v25 = vadd.f32 1.0, %v2055_v23  ;;  %v2057_v27 = vpop.eup %2056  ;;  %v1757_v23 = vld [vmem:[#allocation4 + $0xd8] sm:$0xf0] }
  0xbb   :  { %v2059_v28 = vpop.eup %2058  ;;  %v309_v29 = vmul.f32 %v2057_v27, %v307_v19  ;;  %vm314_vm0 = vweird.f32 %v2057_v27  ;;  %v2008_v19 = vld [vmem:[#allocation4 + $0xd4] sm:$0xf0] }
  0xbc   :  { %2060 = vrcp.f32 %v346_v25  ;;  %v328_v30 = vmul.f32 %v2059_v28, %v326_v20  ;;  %vm333_vm1 = vweird.f32 %v2059_v28  ;;  %vm315_vm4 = vmor %vm313_vm2, %vm314_vm0  ;;  %v358_v57 = vand.u32 2147483648, %v346_v25 }
  0xbd   :  { %2062 = vtanh.f32 %v302_v24  ;;  %v310_v31 = vsub.f32 1.0, %v309_v29  ;;  %vm334_vm5 = vmor %vm332_vm3, %vm333_vm1  ;;  %vm352_vm9 = vweird.f32 %v346_v25  ;;  %v356_v58 = vand.u32 2147483647, %v346_v25  ;;  %v1733_v29 = vld [vmem:[#allocation4 + $0xb0] sm:$0xf0] }
  0xbe   :  { %v329_v32 = vsub.f32 1.0, %v328_v30  ;;  %v359_v60 = vor.u32 1.1754944e-38, %v358_v57  ;;  %v1752_v20 = vor.u32 %v2005_v15, %v1749_v17  ;;  %v1756_v21 = vor.u32 %v2008_v19, %v1755_v18  ;;  %v1739_v30 = vld [vmem:[#allocation4 + $0xa8] sm:$0xf]  ;;  %v1693_v17 = vld [vmem:[#allocation4 + $0x58] sm:$0xf0] }
  0xbf   :  { %v311_v35 = vmul.f32 %v2057_v27, %v310_v31  ;;  %vm357_vm11 = vcmp.eq.f32.partialorder %v356_v58, 8.507059e+37  ;;  %v1760_v24 = vor.u32 %v2006_v22, %v1757_v23  ;;  %v2004_v31 = vld [vmem:[#allocation4 + $0xb4] sm:$0xf0]  ;;  %v1707_v57 = vld [vmem:[#allocation4 + $0x68] sm:$0xf]  ;;  %v1692_v15 = vor.u32 %v1992_v10, %v1691_v9 }
  0xc0   :  { %v330_v37 = vmul.f32 %v2059_v28, %v329_v32  ;;  %903 = vmatpush.bf16.msra.mxu1 %v1752_v20  ;;  %916 = vmatpush.bf16.msra.mxu2 %v1756_v21  ;;  %v1740_v33 = vor.u32 %v2004_v31, %v1739_v30  ;;  %v1996_v58 = vld [vmem:[#allocation4 + $0x74] sm:$0xf0]  ;;  %v1667_v18 = vld [vmem:[#allocation4 + $0x20] sm:$0xf]  ;;  %v1987_v19 = vld [vmem:[#allocation4 + $0x2c] sm:$0xf0]  ;;  %v1696_v20 = vor.u32 %v1990_v16, %v1693_v17 }
  0xc1   :  { %v312_v40 = vadd.f32 %v2057_v27, %v311_v35  ;;  %929 = vmatpush.bf16.msra.mxu3 %v1760_v24  ;;  %v1741_v35 = vld [vmem:[#allocation4 + $0xb8] sm:$0xf0]  ;;  %v1668_v21 = vor.u32 %v1987_v19, %v1667_v18  ;;  %v1985_v22 = vld [vmem:[#allocation4 + $0x24] sm:$0xf]  ;;  %v1669_v23 = vld [vmem:[#allocation4 + $0x30] sm:$0xf0] }
  0xc2   :  { %v2061_v39 = vpop.eup %2060  ;;  %v331_v44 = vadd.f32 %v2059_v28, %v330_v37  ;;  %v1744_v36 = vor.u32 %v2002_v34, %v1741_v35  ;;  %v1715_v37 = vld [vmem:[#allocation4 + $0x80] sm:$0xf]  ;;  %v1675_v24 = vld [vmem:[#allocation4 + $0x28] sm:$0xf]  ;;  %v1983_v34 = vld [vmem:[#allocation4 + $0xc] sm:$0xf0] }
  0xc3   :  { %v2063_v41 = vpop.eup %2062  ;;  %v348_v42 = vmul.f32 %v2061_v39, %v346_v25  ;;  %v316_v47 = vsel %vm315_vm4, %v2057_v27, %v312_v40  ;;  %vm353_vm8 = vweird.f32 %v2061_v39  ;;  %v1731_v25 = vld [vmem:[#allocation4 + $0xa0] sm:$0xf]  ;;  %v2001_v27 = vld [vmem:[#allocation4 + $0xa4] sm:$0xf]  ;;  %v1716_v40 = vor.u32 %v1999_v38, %v1715_v37 }
  0xc4   :  { %v321_v49 = vsel %vm318_vm6, %v320_v43, %v316_v47  ;;  %v335_v50 = vsel %vm334_vm5, %v2059_v28, %v331_v44  ;;  %vm354_vm10 = vmor %vm352_vm9, %vm353_vm8  ;;  %v1732_v28 = vor.u32 %v2003_v26, %v1731_v25  ;;  %v1736_v32 = vor.u32 %v2001_v27, %v1733_v29  ;;  %917 = vmatpush.bf16.msra.mxu2 %v1740_v33  ;;  %v2000_v43 = vld [vmem:[#allocation4 + $0x94] sm:$0xf0]  ;;  %v1725_v47 = vld [vmem:[#allocation4 + $0x98] sm:$0xf0] }
  0xc5   :  { %v349_v48 = vsub.f32 1.0, %v348_v42  ;;  %v340_v51 = vsel %vm337_vm7, %v339_v45, %v335_v50  ;;  %v363_v52 = vmul.f32 %v2063_v41, %v321_v49  ;;  %930 = vmatpush.bf16.msra.mxu3 %v1744_v36  ;;  %v1717_v41 = vld [vmem:[#allocation4 + $0x90] sm:$0xf0]  ;;  %v1723_v42 = vld [vmem:[#allocation4 + $0x88] sm:$0xf]  ;;  %v1672_v25 = vor.u32 %v1985_v22, %v1669_v23 }
  0xc6   :  { %v362_v54 = vmul.f32 %v340_v51, %v44_v46  ;;  %891 = vmatpush.bf16.msra.mxu0 %v1732_v28  ;;  %904 = vmatpush.bf16.msra.mxu1 %v1736_v32  ;;  %v1724_v45 = vor.u32 %v2000_v43, %v1723_v42  ;;  %v1998_v46 = vld [vmem:[#allocation4 + $0x8c] sm:$0xf]  ;;  %v1699_v51 = vld [vmem:[#allocation4 + $0x60] sm:$0xf]  ;;  %v1988_v26 = vld [vmem:[#allocation4 + $0x34] sm:$0xf0] }
  0xc7   :  { %v350_v53 = vmul.f32 %v2061_v39, %v349_v48  ;;  %v1509_v48 = vld [vmem:[%s2319_s0 + $0x20] sm:$0xff]  ;;  %v1510_v49 = vld [vmem:[%s2319_s0 + $0x28] sm:$0xff]  ;;  %v1728_v50 = vor.u32 %v1998_v46, %v1725_v47  ;;  %v1677_v28 = vld [vmem:[#allocation4 + $0x38] sm:$0xf0]  ;;  %v1676_v31 = vor.u32 %v1988_v26, %v1675_v24 }
  0xc8   :  { %v2253_v55 = vadd.f32 %v363_v52, %v362_v54  ;;  %918 = vmatpush.bf16.msra.mxu2 %v1724_v45  ;;  %v1995_v52 = vld [vmem:[#allocation4 + $0x6c] sm:$0xf0]  ;;  %v1986_v27 = vld [vmem:[#allocation4 + $0x2c] sm:$0xf]  ;;  %v1651_v33 = vld [vmem:[#allocation4] sm:$0xf] }
  0xc9   :  { %v351_v56 = vadd.f32 %v2061_v39, %v350_v53  ;;  %v1993_v53 = vld [vmem:[#allocation4 + $0x64] sm:$0xf]  ;;  %931 = vmatpush.bf16.msra.mxu3 %v1728_v50  ;;  %v1700_v54 = vor.u32 %v1995_v52, %v1699_v51  ;;  %v1680_v32 = vor.u32 %v1986_v27, %v1677_v28  ;;  %v1984_v42 = vld [vmem:[#allocation4 + $0x14] sm:$0xf0]  ;;  %v1982_v45 = vld [vmem:[#allocation4 + $0xc] sm:$0xf] }
  0xca   :  { %2064 = vtanh.f32 %v2253_v55  ;;  %892 = vmatpush.bf16.msra.mxu0 %v1716_v40  ;;  %v1981_v35 = vld [vmem:[#allocation4 + $0x4] sm:$0xf]  ;;  %v1653_v40 = vld [vmem:[#allocation4 + $0x10] sm:$0xf0]  ;;  %v1661_v46 = vld [vmem:[#allocation4 + $0x18] sm:$0xf0] }
  0xcb   :  { %v355_v59 = vsel %vm354_vm10, %v2061_v39, %v351_v56  ;;  %v1997_v39 = vld [vmem:[#allocation4 + $0x84] sm:$0xf]  ;;  %v1701_v56 = vld [vmem:[#allocation4 + $0x70] sm:$0xf0]  ;;  %v1656_v43 = vor.u32 %v1981_v35, %v1653_v40 }
  0xcc   :  { %v360_v62 = vsel %vm357_vm11, %v359_v60, %v355_v59  ;;  %v1720_v44 = vor.u32 %v1997_v39, %v1717_v41  ;;  %v1704_v59 = vor.u32 %v1993_v53, %v1701_v56  ;;  %v1708_v60 = vor.u32 %v1996_v58, %v1707_v57  ;;  %v1659_v41 = vld [vmem:[#allocation4 + $0x8] sm:$0xf]  ;;  %v1511_v56 = vld [vmem:[%s2319_s0 + $0x30] sm:$0xff] }
  0xcd   :  { %v1652_v39 = vor.u32 %v1983_v34, %v1651_v33  ;;  %v2043_v33 = vld [vmem:[#allocation4 + $0xec] sm:$0xf0]  ;;  %v2041_v34 = vld [vmem:[#allocation4 + $0xe4] sm:$0xf] }
  0xce   :  { %905 = vmatpush.bf16.msra.mxu1 %v1720_v44  ;;  %893 = vmatpush.bf16.msra.mxu0 %v1700_v54  ;;  %v1660_v44 = vor.u32 %v1984_v42, %v1659_v41  ;;  %v2042_v41 = vld [vmem:[#allocation4 + $0xec] sm:$0xf]  ;;  %v1909_v42 = vld [vmem:[#allocation4 + $0xf8] sm:$0xf0] }
  0xcf   :  { %919 = vmatpush.bf16.msra.mxu2 %v1708_v60 }
  0xd0   :  { %v2065_v61 = vpop.eup %2064 }
  0xd1   :  { %v366_v63 = vmul.f32 %v2065_v61, %v360_v62  ;;  %v1994_v61 = vld [vmem:[#allocation4 + $0x6c] sm:$0xf]  ;;  %v1709_v62 = vld [vmem:[#allocation4 + $0x78] sm:$0xf0] }
  0xd2   :  { %v1712_v1 = vor.u32 %v1994_v61, %v1709_v62  ;;  %906 = vmatpush.bf16.msra.mxu1 %v1704_v59  ;;  %894 = vmatpush.bf16.msra.mxu0 %v1684_v7 }
  0xd3   :  { %367 = vst [vmem:[%s2323_s4] sm:$0xff] %v366_v63  ;;  %v375_v0 = vpack.c.bf16 %v366_v63, %v366_v63  ;;  %920 = vmatpush.bf16.msra.mxu2 %v1692_v15 }
  0xd4   :  { %932 = vmatpush.bf16.msra.mxu3 %v1712_v1 }
  0xd5   :  { %576 = vmatmul.bf16.vlgmr.msrb.gmra.mxu0 %v375_v0  ;;  %589 = vmatmul.bf16.vlgmr.msrb.gmra.mxu1 %v375_v0 }
  0xd6   :  { %602 = vmatmul.bf16.vlgmr.msrb.gmra.mxu2 %v375_v0  ;;  %615 = vmatmul.bf16.vlgmr.msrb.gmra.mxu3 %v375_v0 }
  0xd7   :  { %907 = vmatpush.bf16.msra.mxu1 %v1688_v14  ;;  %895 = vmatpush.bf16.msra.mxu0 %v1668_v21 }
  0xd8   :  { %933 = vmatpush.bf16.msra.mxu3 %v1696_v20  ;;  %921 = vmatpush.bf16.msra.mxu2 %v1676_v31 }
  0xdb   :  { %908 = vmatpush.bf16.msra.mxu1 %v1672_v25  ;;  %896 = vmatpush.bf16.msra.mxu0 %v1652_v39 }
  0xdc   :  { %934 = vmatpush.bf16.msra.mxu3 %v1680_v32  ;;  %922 = vmatpush.bf16.msra.mxu2 %v1660_v44  ;;  %v1899_v32 = vld [vmem:[#allocation4 + $0xe0] sm:$0xf] }
  0xdd   :  { %v1900_v35 = vor.u32 %v2043_v33, %v1899_v32  ;;  %v1883_v44 = vld [vmem:[#allocation4 + $0xc0] sm:$0xf] }
  0xdf   :  { %909 = vmatpush.bf16.msra.mxu1 %v1656_v43  ;;  %1210 = vmatpush.bf16.msrb.mxu0 %v1900_v35  ;;  %v1912_v43 = vor.u32 %v2042_v41, %v1909_v42  ;;  %v1819_v35 = vld [vmem:[#allocation4 + $0x40] sm:$0xf]  ;;  %v2024_v41 = vld [vmem:[#allocation4 + $0x54] sm:$0xf0] }
 0x152   :  { %v577_v63 = vpop.f32.mrf.mxu0  ;;  %v590_v0 = vpop.f32.mrf.mxu1 }
 0x153   :  { %v620_v2 = vadd.f32 %v1509_v48, %v577_v63  ;;  %v621_v3 = vadd.f32 %v1510_v49, %v590_v0  ;;  %v1664_v49 = vor.u32 %v1982_v45, %v1661_v46  ;;  %v2039_v45 = vld [vmem:[#allocation4 + $0xcc] sm:$0xf0]  ;;  %v2037_v46 = vld [vmem:[#allocation4 + $0xc4] sm:$0xf] }
 0x155   :  { %v1641_v11 = vmul.f32 -1.442695, %v620_v2  ;;  %v1642_v12 = vmul.f32 -1.442695, %v621_v3  ;;  %935 = vmatpush.bf16.msra.mxu3 %v1664_v49  ;;  %v1891_v49 = vld [vmem:[#allocation4 + $0xc8] sm:$0xf] }
 0x157   :  { %2066 = vpow2.f32 %v1641_v11 }
 0x158   :  { %2068 = vpow2.f32 %v1642_v12 }
 0x159   :  { %v603_v29 = vpop.f32.mrf.mxu2  ;;  %v616_v30 = vpop.f32.mrf.mxu3  ;;  %1249 = vmatpush.bf16.msrb.mxu3 %v1912_v43 }
 0x15a   :  { %v623_v36 = vadd.f32 %v1512_v13, %v616_v30  ;;  %v579_v37 = vpop.f32.mrf.mxu0  ;;  %v592_v38 = vpop.f32.mrf.mxu1  ;;  %v622_v60 = vadd.f32 %v1511_v56, %v603_v29 }
 0x15b   :  { %v1907_v37 = vld [vmem:[#allocation4 + $0xe8] sm:$0xf]  ;;  %v2044_v38 = vld [vmem:[#allocation4 + $0xf4] sm:$0xf0] }
 0x15c   :  { %v1643_v47 = vmul.f32 -1.442695, %v623_v36  ;;  %v1901_v36 = vld [vmem:[#allocation4 + $0xf0] sm:$0xf0]  ;;  %v1908_v40 = vor.u32 %v2044_v38, %v1907_v37  ;;  %v2021_v37 = vld [vmem:[#allocation4 + $0x44] sm:$0xf] }
 0x15d   :  { %v2067_v48 = vpop.eup %2066  ;;  %v1904_v39 = vor.u32 %v2041_v34, %v1901_v36  ;;  %v2023_v36 = vld [vmem:[#allocation4 + $0x4c] sm:$0xf0] }
 0x15e   :  { %v2069_v50 = vpop.eup %2068  ;;  %v627_v51 = vadd.f32 1.0, %v2067_v48  ;;  %2070 = vpow2.f32 %v1643_v47  ;;  %1236 = vmatpush.bf16.msrb.mxu2 %v1908_v40  ;;  %v1884_v47 = vor.u32 %v2039_v45, %v1883_v44  ;;  %v1885_v48 = vld [vmem:[#allocation4 + $0xd0] sm:$0xf0]  ;;  %v1820_v38 = vor.u32 %v2023_v36, %v1819_v35  ;;  %v1827_v40 = vld [vmem:[#allocation4 + $0x48] sm:$0xf]  ;;  %v1648_v44 = vld [vmem:[%s2319_s0 + $0x58] sm:$0xff] }
 0x15f   :  { %v646_v52 = vadd.f32 1.0, %v2069_v50  ;;  %1223 = vmatpush.bf16.msrb.mxu1 %v1904_v39  ;;  %v2040_v50 = vld [vmem:[#allocation4 + $0xd4] sm:$0xf0]  ;;  %v1821_v39 = vld [vmem:[#allocation4 + $0x50] sm:$0xf0] }
 0x160   :  { %2072 = vrcp.f32 %v627_v51  ;;  %v639_v2 = vand.u32 2147483648, %v627_v51  ;;  %v637_v5 = vand.u32 2147483647, %v627_v51  ;;  %vm633_vm14 = vweird.f32 %v627_v51  ;;  %1211 = vmatpush.bf16.msrb.mxu0 %v1884_v47  ;;  %v2022_v47 = vld [vmem:[#allocation4 + $0x4c] sm:$0xf] }
 0x161   :  { %2074 = vrcp.f32 %v646_v52  ;;  %v605_v53 = vpop.f32.mrf.mxu2  ;;  %v618_v54 = vpop.f32.mrf.mxu3  ;;  %v658_v3 = vand.u32 2147483648, %v646_v52  ;;  %v656_v7 = vand.u32 2147483647, %v646_v52  ;;  %vm652_vm15 = vweird.f32 %v646_v52 }
 0x162   :  { %v640_v10 = vor.u32 1.1754944e-38, %v639_v2  ;;  %vm638_vm2 = vcmp.eq.f32.partialorder %v637_v5, 8.507059e+37  ;;  %v2038_v53 = vld [vmem:[#allocation4 + $0xcc] sm:$0xf]  ;;  %v1893_v54 = vld [vmem:[#allocation4 + $0xd8] sm:$0xf0]  ;;  %v1824_v45 = vor.u32 %v2021_v37, %v1821_v39 }
 0x163   :  { %v659_v13 = vor.u32 1.1754944e-38, %v658_v3  ;;  %vm657_vm3 = vcmp.eq.f32.partialorder %v656_v7, 8.507059e+37  ;;  %v1896_v56 = vor.u32 %v2038_v53, %v1893_v54  ;;  %v2034_v2 = vld [vmem:[#allocation4 + $0xac] sm:$0xf]  ;;  %v1877_v3 = vld [vmem:[#allocation4 + $0xb8] sm:$0xf0] }
 0x164   :  { %v2071_v57 = vpop.eup %2070  ;;  %v1851_v5 = vld [vmem:[#allocation4 + $0x80] sm:$0xf]  ;;  %v2029_v7 = vld [vmem:[#allocation4 + $0x84] sm:$0xf]  ;;  %v1805_v54 = vld [vmem:[#allocation4 + $0x30] sm:$0xf0] }
 0x165   :  { %v666_v58 = vadd.f32 1.0, %v2071_v57  ;;  %v1867_v57 = vld [vmem:[#allocation4 + $0xa0] sm:$0xf]  ;;  %1250 = vmatpush.bf16.msrb.mxu3 %v1896_v56  ;;  %v2017_v53 = vld [vmem:[#allocation4 + $0x24] sm:$0xf] }
 0x166   :  { %v2073_v59 = vpop.eup %2072  ;;  %v1811_v56 = vld [vmem:[#allocation4 + $0x28] sm:$0xf] }
 0x167   :  { %v2075_v61 = vpop.eup %2074  ;;  %v629_v62 = vmul.f32 %v2073_v59, %v627_v51  ;;  %2076 = vrcp.f32 %v666_v58  ;;  %vm634_vm12 = vweird.f32 %v2073_v59  ;;  %v678_v25 = vand.u32 2147483648, %v666_v58 }
 0x168   :  { %v648_v63 = vmul.f32 %v2075_v61, %v646_v52  ;;  %2078 = vtanh.f32 %v622_v60  ;;  %vm653_vm13 = vweird.f32 %v2075_v61  ;;  %vm635_vm0 = vmor %vm633_vm14, %vm634_vm12  ;;  %vm672_vm5 = vweird.f32 %v666_v58 }
 0x169   :  { %v630_v0 = vsub.f32 1.0, %v629_v62  ;;  %vm654_vm1 = vmor %vm652_vm15, %vm653_vm13  ;;  %v676_v26 = vand.u32 2147483647, %v666_v58  ;;  %v679_v28 = vor.u32 1.1754944e-38, %v678_v25  ;;  %v1888_v51 = vor.u32 %v2037_v46, %v1885_v48  ;;  %v1875_v62 = vld [vmem:[#allocation4 + $0xa8] sm:$0xf] }
 0x16a   :  { %v649_v1 = vsub.f32 1.0, %v648_v63  ;;  %v1892_v52 = vor.u32 %v2040_v50, %v1891_v49  ;;  %v2036_v63 = vld [vmem:[#allocation4 + $0xb4] sm:$0xf0]  ;;  %v1843_v25 = vld [vmem:[#allocation4 + $0x68] sm:$0xf]  ;;  %v1828_v46 = vor.u32 %v2024_v41, %v1827_v40 }
 0x16b   :  { %v631_v4 = vmul.f32 %v2073_v59, %v630_v0  ;;  %vm677_vm7 = vcmp.eq.f32.partialorder %v676_v26, 8.507059e+37  ;;  %1224 = vmatpush.bf16.msrb.mxu1 %v1888_v51  ;;  %v2028_v26 = vld [vmem:[#allocation4 + $0x74] sm:$0xf0]  ;;  %v1829_v48 = vld [vmem:[#allocation4 + $0x58] sm:$0xf0] }
 0x16c   :  { %v650_v6 = vmul.f32 %v2075_v61, %v649_v1  ;;  %1237 = vmatpush.bf16.msrb.mxu2 %v1892_v52  ;;  %v1876_v1 = vor.u32 %v2036_v63, %v1875_v62  ;;  %v1803_v49 = vld [vmem:[#allocation4 + $0x20] sm:$0xf]  ;;  %v2019_v50 = vld [vmem:[#allocation4 + $0x2c] sm:$0xf0]  ;;  %v1832_v51 = vor.u32 %v2022_v47, %v1829_v48 }
 0x16d   :  { %v2077_v8 = vpop.eup %2076  ;;  %v632_v9 = vadd.f32 %v2073_v59, %v631_v4  ;;  %v1880_v4 = vor.u32 %v2034_v2, %v1877_v3  ;;  %v1804_v52 = vor.u32 %v2019_v50, %v1803_v49  ;;  %v2015_v2 = vld [vmem:[#allocation4 + $0xc] sm:$0xf0]  ;;  %v2013_v3 = vld [vmem:[#allocation4 + $0x4] sm:$0xf] }
 0x16e   :  { %v651_v11 = vadd.f32 %v2075_v61, %v650_v6  ;;  %v668_v12 = vmul.f32 %v2077_v8, %v666_v58  ;;  %v2079_v15 = vpop.eup %2078  ;;  %vm673_vm4 = vweird.f32 %v2077_v8  ;;  %v2035_v58 = vld [vmem:[#allocation4 + $0xac] sm:$0xf0] }
 0x16f   :  { %v636_v14 = vsel %vm635_vm0, %v2073_v59, %v632_v9  ;;  %vm674_vm6 = vmor %vm672_vm5, %vm673_vm4  ;;  %v2033_v59 = vld [vmem:[#allocation4 + $0xa4] sm:$0xf]  ;;  %v1868_v60 = vor.u32 %v2035_v58, %v1867_v57  ;;  %v2031_v6 = vld [vmem:[#allocation4 + $0x8c] sm:$0xf0]  ;;  %1251 = vmatpush.bf16.msrb.mxu3 %v1880_v4  ;;  %v1808_v57 = vor.u32 %v2017_v53, %v1805_v54 }
 0x170   :  { %v641_v16 = vsel %vm638_vm2, %v640_v10, %v636_v14  ;;  %v655_v17 = vsel %vm654_vm1, %v2075_v61, %v651_v11  ;;  %v669_v18 = vsub.f32 1.0, %v668_v12  ;;  %v1869_v61 = vld [vmem:[#allocation4 + $0xb0] sm:$0xf0]  ;;  %1238 = vmatpush.bf16.msrb.mxu2 %v1876_v1  ;;  %v1859_v10 = vld [vmem:[#allocation4 + $0x88] sm:$0xf] }
 0x171   :  { %v660_v19 = vsel %vm657_vm3, %v659_v13, %v655_v17  ;;  %v683_v20 = vmul.f32 %v2079_v15, %v641_v16  ;;  %v1872_v0 = vor.u32 %v2033_v59, %v1869_v61  ;;  %1212 = vmatpush.bf16.msrb.mxu0 %v1868_v60  ;;  %v1853_v9 = vld [vmem:[#allocation4 + $0x90] sm:$0xf0]  ;;  %v2032_v11 = vld [vmem:[#allocation4 + $0x94] sm:$0xf0]  ;;  %v2030_v14 = vld [vmem:[#allocation4 + $0x8c] sm:$0xf] }
 0x172   :  { %v682_v21 = vmul.f32 %v660_v19, %v2253_v55  ;;  %v670_v22 = vmul.f32 %v2077_v8, %v669_v18  ;;  %v1856_v12 = vor.u32 %v2029_v7, %v1853_v9  ;;  %v1860_v13 = vor.u32 %v2032_v11, %v1859_v10  ;;  %v1861_v15 = vld [vmem:[#allocation4 + $0x98] sm:$0xf0]  ;;  %v1645_v16 = vld [vmem:[%s2319_s0 + $0x40] sm:$0xff]  ;;  %v1646_v17 = vld [vmem:[%s2319_s0 + $0x48] sm:$0xff] }
 0x173   :  { %1225 = vmatpush.bf16.msrb.mxu1 %v1872_v0  ;;  %v1864_v18 = vor.u32 %v2030_v14, %v1861_v15  ;;  %v1835_v19 = vld [vmem:[#allocation4 + $0x60] sm:$0xf]  ;;  %v2020_v58 = vld [vmem:[#allocation4 + $0x34] sm:$0xf0]  ;;  %v2018_v59 = vld [vmem:[#allocation4 + $0x2c] sm:$0xf] }
 0x174   :  { %v2272_v23 = vadd.f32 %v683_v20, %v682_v21  ;;  %v671_v24 = vadd.f32 %v2077_v8, %v670_v22  ;;  %1239 = vmatpush.bf16.msrb.mxu2 %v1860_v13  ;;  %v2027_v20 = vld [vmem:[#allocation4 + $0x6c] sm:$0xf0]  ;;  %v2025_v21 = vld [vmem:[#allocation4 + $0x64] sm:$0xf]  ;;  %v1813_v60 = vld [vmem:[#allocation4 + $0x38] sm:$0xf0]  ;;  %v1812_v63 = vor.u32 %v2020_v58, %v1811_v56 }
 0x175   :  { %1252 = vmatpush.bf16.msrb.mxu3 %v1864_v18  ;;  %v1836_v22 = vor.u32 %v2027_v20, %v1835_v19  ;;  %v1816_v0 = vor.u32 %v2018_v59, %v1813_v60  ;;  %v1787_v1 = vld [vmem:[#allocation4] sm:$0xf]  ;;  %v1795_v9 = vld [vmem:[#allocation4 + $0x8] sm:$0xf]  ;;  %v2016_v10 = vld [vmem:[#allocation4 + $0x14] sm:$0xf0] }
 0x176   :  { %2080 = vtanh.f32 %v2272_v23  ;;  %v675_v27 = vsel %vm674_vm6, %v2077_v8, %v671_v24  ;;  %v1852_v8 = vor.u32 %v2031_v6, %v1851_v5  ;;  %v1837_v24 = vld [vmem:[#allocation4 + $0x70] sm:$0xf0]  ;;  %v1788_v7 = vor.u32 %v2015_v2, %v1787_v1  ;;  %v2014_v13 = vld [vmem:[#allocation4 + $0xc] sm:$0xf]  ;;  %v1797_v14 = vld [vmem:[#allocation4 + $0x18] sm:$0xf0] }
 0x177   :  { %v680_v30 = vsel %vm677_vm7, %v679_v28, %v675_v27  ;;  %1226 = vmatpush.bf16.msrb.mxu1 %v1856_v12  ;;  %v1840_v27 = vor.u32 %v2025_v21, %v1837_v24  ;;  %v1844_v28 = vor.u32 %v2028_v26, %v1843_v25  ;;  %v1796_v12 = vor.u32 %v2016_v10, %v1795_v9  ;;  %v1647_v24 = vld [vmem:[%s2319_s0 + $0x50] sm:$0xff]  ;;  %v1782_v1 = vld [vmem:[%s2319_s0 + $0x68] sm:$0xff] }
 0x178   :  { %1213 = vmatpush.bf16.msrb.mxu0 %v1852_v8  ;;  %v1789_v8 = vld [vmem:[#allocation4 + $0x10] sm:$0xf0] }
 0x179   :  { %1240 = vmatpush.bf16.msrb.mxu2 %v1844_v28  ;;  %v1792_v11 = vor.u32 %v2013_v3, %v1789_v8  ;;  %v1784_v8 = vld [vmem:[%s2319_s0 + $0x78] sm:$0xff] }
 0x17b   :  { %1227 = vmatpush.bf16.msrb.mxu1 %v1840_v27 }
 0x17c   :  { %v2081_v29 = vpop.eup %2080  ;;  %1214 = vmatpush.bf16.msrb.mxu0 %v1836_v22 }
 0x17d   :  { %v686_v31 = vmul.f32 %v2081_v29, %v680_v30  ;;  %v2026_v29 = vld [vmem:[#allocation4 + $0x6c] sm:$0xf]  ;;  %v1845_v30 = vld [vmem:[#allocation4 + $0x78] sm:$0xf0]  ;;  %1241 = vmatpush.bf16.msrb.mxu2 %v1828_v46 }
 0x17e   :  { %v1848_v32 = vor.u32 %v2026_v29, %v1845_v30 }
 0x17f   :  { %1644 = vst [vmem:[%s2323_s4 + $0x8] sm:$0xff] %v686_v31  ;;  %v696_v55 = vpack.c.bf16 %v686_v31, %v686_v31  ;;  %1228 = vmatpush.bf16.msrb.mxu1 %v1824_v45 }
 0x180   :  { %1253 = vmatpush.bf16.msrb.mxu3 %v1848_v32  ;;  %1215 = vmatpush.bf16.msrb.mxu0 %v1820_v38 }
 0x181   :  { %897 = vmatmul.bf16.vlgmr.msra.gmra.mxu0 %v696_v55  ;;  %910 = vmatmul.bf16.vlgmr.msra.gmra.mxu1 %v696_v55 }
 0x182   :  { %923 = vmatmul.bf16.vlgmr.msra.gmra.mxu2 %v696_v55  ;;  %936 = vmatmul.bf16.vlgmr.msra.gmra.mxu3 %v696_v55 }
 0x183   :  { %1229 = vmatpush.bf16.msrb.mxu1 %v1808_v57  ;;  %1242 = vmatpush.bf16.msrb.mxu2 %v1812_v63 }
 0x184   :  { %1254 = vmatpush.bf16.msrb.mxu3 %v1832_v51  ;;  %1216 = vmatpush.bf16.msrb.mxu0 %v1804_v52 }
 0x187   :  { %1230 = vmatpush.bf16.msrb.mxu1 %v1792_v11  ;;  %1243 = vmatpush.bf16.msrb.mxu2 %v1796_v12 }
 0x188   :  { %1255 = vmatpush.bf16.msrb.mxu3 %v1816_v0  ;;  %1217 = vmatpush.bf16.msrb.mxu0 %v1788_v7  ;;  %v1781_v0 = vld [vmem:[%s2319_s0 + $0x60] sm:$0xff] }
 0x1fe   :  { %v898_v31 = vpop.f32.mrf.mxu0  ;;  %v911_v55 = vpop.f32.mrf.mxu1 }
 0x1ff   :  { %v941_v33 = vadd.f32 %v1645_v16, %v898_v31  ;;  %v942_v34 = vadd.f32 %v1646_v17, %v911_v55  ;;  %v1800_v17 = vor.u32 %v2014_v13, %v1797_v14 }
 0x201   :  { %v1777_v42 = vmul.f32 -1.442695, %v941_v33  ;;  %v1778_v43 = vmul.f32 -1.442695, %v942_v34  ;;  %1256 = vmatpush.bf16.msrb.mxu3 %v1800_v17 }
 0x203   :  { %2082 = vpow2.f32 %v1777_v42 }
 0x204   :  { %2084 = vpow2.f32 %v1778_v43 }
 0x205   :  { %v924_v61 = vpop.f32.mrf.mxu2  ;;  %v937_v62 = vpop.f32.mrf.mxu3 }
 0x206   :  { %v944_v4 = vadd.f32 %v1648_v44, %v937_v62  ;;  %v900_v5 = vpop.f32.mrf.mxu0  ;;  %v913_v6 = vpop.f32.mrf.mxu1  ;;  %v943_v28 = vadd.f32 %v1647_v24, %v924_v61 }
 0x208   :  { %v1779_v15 = vmul.f32 -1.442695, %v944_v4 }
 0x209   :  { %v2083_v16 = vpop.eup %2082 }
 0x20a   :  { %v2085_v18 = vpop.eup %2084  ;;  %v948_v19 = vadd.f32 1.0, %v2083_v16  ;;  %2086 = vpow2.f32 %v1779_v15 }
 0x20b   :  { %v967_v20 = vadd.f32 1.0, %v2085_v18 }
 0x20c   :  { %2088 = vrcp.f32 %v948_v19  ;;  %v960_v33 = vand.u32 2147483648, %v948_v19  ;;  %v958_v36 = vand.u32 2147483647, %v948_v19  ;;  %vm954_vm10 = vweird.f32 %v948_v19 }
 0x20d   :  { %2090 = vrcp.f32 %v967_v20  ;;  %v926_v21 = vpop.f32.mrf.mxu2  ;;  %v939_v22 = vpop.f32.mrf.mxu3  ;;  %v979_v34 = vand.u32 2147483648, %v967_v20  ;;  %v977_v38 = vand.u32 2147483647, %v967_v20  ;;  %vm973_vm11 = vweird.f32 %v967_v20 }
 0x20e   :  { %v961_v41 = vor.u32 1.1754944e-38, %v960_v33  ;;  %vm959_vm14 = vcmp.eq.f32.partialorder %v958_v36, 8.507059e+37  ;;  %v1783_v21 = vld [vmem:[%s2319_s0 + $0x70] sm:$0xff]  ;;  %s2195_s0 = smov [#allocation8]  }
 0x20f   :  { %v980_v44 = vor.u32 1.1754944e-38, %v979_v34  ;;  %vm978_vm15 = vcmp.eq.f32.partialorder %v977_v38, 8.507059e+37  ;;  %s1356_s16 = sshll.u32 %s2195_s0, 4  ;;  %s1357_s16 = int_to_ptr.vmem [resolvable:$true] %s1356_s16 }
 0x210   :  { %v2087_v25 = vpop.eup %2086 }
 0x211   :  { %v987_v26 = vadd.f32 1.0, %v2087_v25 }
 0x212   :  { %v2089_v27 = vpop.eup %2088 }
 0x213   :  { %v2091_v29 = vpop.eup %2090  ;;  %v950_v30 = vmul.f32 %v2089_v27, %v948_v19  ;;  %2092 = vrcp.f32 %v987_v26  ;;  %vm955_vm8 = vweird.f32 %v2089_v27  ;;  %v999_v57 = vand.u32 2147483648, %v987_v26 }
 0x214   :  { %v969_v31 = vmul.f32 %v2091_v29, %v967_v20  ;;  %2094 = vtanh.f32 %v943_v28  ;;  %vm974_vm9 = vweird.f32 %v2091_v29  ;;  %vm956_vm12 = vmor %vm954_vm10, %vm955_vm8  ;;  %vm993_vm1 = vweird.f32 %v987_v26 }
 0x215   :  { %v951_v55 = vsub.f32 1.0, %v950_v30  ;;  %vm975_vm13 = vmor %vm973_vm11, %vm974_vm9  ;;  %v997_v58 = vand.u32 2147483647, %v987_v26  ;;  %v1000_v60 = vor.u32 1.1754944e-38, %v999_v57 }
 0x216   :  { %v970_v32 = vsub.f32 1.0, %v969_v31 }
 0x217   :  { %v952_v35 = vmul.f32 %v2089_v27, %v951_v55  ;;  %vm998_vm3 = vcmp.eq.f32.partialorder %v997_v58, 8.507059e+37 }
 0x218   :  { %v971_v37 = vmul.f32 %v2091_v29, %v970_v32 }
 0x219   :  { %v2093_v39 = vpop.eup %2092  ;;  %v953_v40 = vadd.f32 %v2089_v27, %v952_v35 }
 0x21a   :  { %v972_v42 = vadd.f32 %v2091_v29, %v971_v37  ;;  %v989_v43 = vmul.f32 %v2093_v39, %v987_v26  ;;  %v2095_v46 = vpop.eup %2094  ;;  %vm994_vm0 = vweird.f32 %v2093_v39 }
 0x21b   :  { %v957_v45 = vsel %vm956_vm12, %v2089_v27, %v953_v40  ;;  %vm995_vm2 = vmor %vm993_vm1, %vm994_vm0 }
 0x21c   :  { %v962_v47 = vsel %vm959_vm14, %v961_v41, %v957_v45  ;;  %v976_v48 = vsel %vm975_vm13, %v2091_v29, %v972_v42  ;;  %v990_v49 = vsub.f32 1.0, %v989_v43 }
 0x21d   :  { %v981_v50 = vsel %vm978_vm15, %v980_v44, %v976_v48  ;;  %v1004_v51 = vmul.f32 %v2095_v46, %v962_v47 }
 0x21e   :  { %v1003_v52 = vmul.f32 %v981_v50, %v2272_v23  ;;  %v991_v53 = vmul.f32 %v2093_v39, %v990_v49 }
 0x220   :  { %v2291_v54 = vadd.f32 %v1004_v51, %v1003_v52  ;;  %v992_v56 = vadd.f32 %v2093_v39, %v991_v53 }
 0x222   :  { %2096 = vtanh.f32 %v2291_v54  ;;  %v996_v59 = vsel %vm995_vm2, %v2093_v39, %v992_v56 }
 0x223   :  { %v1001_v62 = vsel %vm998_vm3, %v1000_v60, %v996_v59 }
 0x228   :  { %v2097_v61 = vpop.eup %2096 }
 0x229   :  { %v1007_v63 = vmul.f32 %v2097_v61, %v1001_v62 }
 0x22b   :  { %1780 = vst [vmem:[%s2323_s4 + $0x10] sm:$0xff] %v1007_v63  ;;  %v1017_v23 = vpack.c.bf16 %v1007_v63, %v1007_v63 }
 0x22d   :  { %1218 = vmatmul.bf16.vlgmr.msrb.gmra.mxu0 %v1017_v23  ;;  %1231 = vmatmul.bf16.vlgmr.msrb.gmra.mxu1 %v1017_v23 }
 0x22e   :  { %1244 = vmatmul.bf16.vlgmr.msrb.gmra.mxu2 %v1017_v23  ;;  %1257 = vmatmul.bf16.vlgmr.msrb.gmra.mxu3 %v1017_v23 }
 0x2aa   :  { %v1219_v2 = vpop.f32.mrf.mxu0  ;;  %v1232_v3 = vpop.f32.mrf.mxu1 }
 0x2ab   :  { %v1262_v4 = vadd.f32 %v1781_v0, %v1219_v2  ;;  %v1263_v5 = vadd.f32 %v1782_v1, %v1232_v3 }
 0x2ad   :  { %v1913_v6 = vmul.f32 -1.442695, %v1262_v4  ;;  %v1914_v7 = vmul.f32 -1.442695, %v1263_v5 }
 0x2af   :  { %2098 = vpow2.f32 %v1913_v6 }
 0x2b0   :  { %2100 = vpow2.f32 %v1914_v7 }
 0x2b1   :  { %v1245_v9 = vpop.f32.mrf.mxu2  ;;  %v1258_v10 = vpop.f32.mrf.mxu3 }
 0x2b2   :  { %v1265_v11 = vadd.f32 %v1784_v8, %v1258_v10  ;;  %v1221_v12 = vpop.f32.mrf.mxu0  ;;  %v1234_v13 = vpop.f32.mrf.mxu1  ;;  %v1264_v26 = vadd.f32 %v1783_v21, %v1245_v9 }
 0x2b4   :  { %v1915_v14 = vmul.f32 -1.442695, %v1265_v11 }
 0x2b5   :  { %v2099_v15 = vpop.eup %2098 }
 0x2b6   :  { %v2101_v16 = vpop.eup %2100  ;;  %v1269_v17 = vadd.f32 1.0, %v2099_v15  ;;  %2102 = vpow2.f32 %v1915_v14 }
 0x2b7   :  { %v1288_v18 = vadd.f32 1.0, %v2101_v16 }
 0x2b8   :  { %2104 = vrcp.f32 %v1269_v17  ;;  %v1281_v55 = vand.u32 2147483648, %v1269_v17  ;;  %v1279_v34 = vand.u32 2147483647, %v1269_v17  ;;  %vm1275_vm6 = vweird.f32 %v1269_v17 }
 0x2b9   :  { %2106 = vrcp.f32 %v1288_v18  ;;  %v1247_v19 = vpop.f32.mrf.mxu2  ;;  %v1260_v20 = vpop.f32.mrf.mxu3  ;;  %v1300_v32 = vand.u32 2147483648, %v1288_v18  ;;  %v1298_v36 = vand.u32 2147483647, %v1288_v18  ;;  %vm1294_vm7 = vweird.f32 %v1288_v18 }
 0x2ba   :  { %v1282_v39 = vor.u32 1.1754944e-38, %v1281_v55  ;;  %vm1280_vm10 = vcmp.eq.f32.partialorder %v1279_v34, 8.507059e+37 }
 0x2bb   :  { %v1301_v42 = vor.u32 1.1754944e-38, %v1300_v32  ;;  %vm1299_vm11 = vcmp.eq.f32.partialorder %v1298_v36, 8.507059e+37 }
 0x2bc   :  { %v2103_v22 = vpop.eup %2102 }
 0x2bd   :  { %v1308_v24 = vadd.f32 1.0, %v2103_v22 }
 0x2be   :  { %v2105_v25 = vpop.eup %2104 }
 0x2bf   :  { %v2107_v27 = vpop.eup %2106  ;;  %v1271_v28 = vmul.f32 %v2105_v25, %v1269_v17  ;;  %2108 = vrcp.f32 %v1308_v24  ;;  %vm1276_vm4 = vweird.f32 %v2105_v25  ;;  %v1320_v56 = vand.u32 2147483648, %v1308_v24 }
 0x2c0   :  { %v1290_v29 = vmul.f32 %v2107_v27, %v1288_v18  ;;  %2110 = vtanh.f32 %v1264_v26  ;;  %vm1295_vm5 = vweird.f32 %v2107_v27  ;;  %vm1277_vm8 = vmor %vm1275_vm6, %vm1276_vm4  ;;  %vm1314_vm13 = vweird.f32 %v1308_v24 }
 0x2c1   :  { %v1272_v30 = vsub.f32 1.0, %v1271_v28  ;;  %vm1296_vm9 = vmor %vm1294_vm7, %vm1295_vm5  ;;  %v1318_v57 = vand.u32 2147483647, %v1308_v24  ;;  %v1321_v59 = vor.u32 1.1754944e-38, %v1320_v56 }
 0x2c2   :  { %v1291_v31 = vsub.f32 1.0, %v1290_v29 }
 0x2c3   :  { %v1273_v33 = vmul.f32 %v2105_v25, %v1272_v30  ;;  %vm1319_vm15 = vcmp.eq.f32.partialorder %v1318_v57, 8.507059e+37 }
 0x2c4   :  { %v1292_v35 = vmul.f32 %v2107_v27, %v1291_v31 }
 0x2c5   :  { %v2109_v37 = vpop.eup %2108  ;;  %v1274_v38 = vadd.f32 %v2105_v25, %v1273_v33 }
 0x2c6   :  { %v1293_v40 = vadd.f32 %v2107_v27, %v1292_v35  ;;  %v1310_v41 = vmul.f32 %v2109_v37, %v1308_v24  ;;  %v2111_v44 = vpop.eup %2110  ;;  %vm1315_vm12 = vweird.f32 %v2109_v37 }
 0x2c7   :  { %v1278_v43 = vsel %vm1277_vm8, %v2105_v25, %v1274_v38  ;;  %vm1316_vm14 = vmor %vm1314_vm13, %vm1315_vm12 }
 0x2c8   :  { %v1283_v45 = vsel %vm1280_vm10, %v1282_v39, %v1278_v43  ;;  %v1297_v46 = vsel %vm1296_vm9, %v2107_v27, %v1293_v40  ;;  %v1311_v47 = vsub.f32 1.0, %v1310_v41 }
 0x2c9   :  { %v1302_v48 = vsel %vm1299_vm11, %v1301_v42, %v1297_v46  ;;  %v1325_v49 = vmul.f32 %v2111_v44, %v1283_v45 }
 0x2ca   :  { %v1324_v50 = vmul.f32 %v1302_v48, %v2291_v54  ;;  %v1312_v51 = vmul.f32 %v2109_v37, %v1311_v47 }
 0x2cc   :  { %v1326_v52 = vadd.f32 %v1325_v49, %v1324_v50  ;;  %v1313_v53 = vadd.f32 %v2109_v37, %v1312_v51 }
 0x2ce   :  { %2112 = vtanh.f32 %v1326_v52  ;;  %1337 = vst [vmem:[#allocation8] sm:$0xff] %v1326_v52  ;;  %v1317_v58 = vsel %vm1316_vm14, %v2109_v37, %v1313_v53 }
 0x2cf   :  { %1361 = dma.vmem_to_hbm [thread:$0]  %s1357_s16, 128, %s1359_s19, [#allocation9]   ;;  %v1322_v60 = vsel %vm1319_vm15, %v1321_v59, %v1317_v58 }
 0x2d4   :  { %v2113_v54 = vpop.eup %2112 }
 0x2d5   :  { %v1328_v61 = vmul.f32 %v2113_v54, %v1322_v60 }
 0x2d7   :  { %1916 = vst [vmem:[%s2323_s4 + $0x18] sm:$0xff] %v1328_v61 }
 0x2d8   :  { %1336 = vst [vmem:[#allocation7] sm:$0xff] %v1328_v61 }
 0x2d9   :  { %1350 = dma.vmem_to_hbm [thread:$0]  %s1346_s6, 128, %s1348_s23, [#allocation6]  }
 0x2da   :  { %2188 = dma.done.wait [#allocation6], 128  }
 0x2db   :  { %2189 = vsyncadd [#allocation6], 4294967168 }
 0x2dc   :  { %2190 = dma.done.wait [#allocation9], 128  }
 0x2dd   :  { %2191 = vsyncadd [#allocation9], 4294967168 }
 0x2de   :  { %1372 = vsyncpa [#allocation5], 1 }
 0x2df   :  { %1373 = vsyncpa [#allocation6], 1 }
 0x2e0   :  { %1374 = vsyncpa [#allocation9], 1 }

</bundles_post_ra>
